<compile_context>
chip_gen: v5e
topology: v5e:2x2
jax: 0.10.0
libtpu: 0.0.40
codegen_flags: <defaults>
</compile_context>

<pallas_src>
import math
from functools import partial

import numpy as np
import jax
import jax.numpy as jnp
from jax.experimental import pallas as pl

# ----- module hyper-parameters (Relation_Encoder(v_dim, out_dim, nongt_dim, ...)) -----
V_DIM = 48          # v_dim  (!= out_dim so v_transform is present)
OUT_DIM = 32        # out_dim
NONGT_DIM = 8       # nongt_dim
NUM_HEADS = 4       # num_heads
POS_EMB_DIM = 64    # pos_emb_dim
NUM_STEPS = 1       # num_steps (default)
RESIDUAL = True     # residual_connection (default)
HEAD_DIM = OUT_DIM // NUM_HEADS

B = 2               # batch_size
N_ROIS = 8          # num_rois (== nongt_dim, matching the typical setup)


def _relation_encoder_kernel(v_ref, pos_ref, wv_ref, wsqk_ref, wp_ref, wo_ref,
                             bias_ref, out_ref,
                             *, batch, num_heads, head_dim, nongt, num_rois,
                             out_dim, num_steps, residual):
    f32 = jnp.float32
    bf16 = jnp.bfloat16
    D = out_dim
    dot = partial(jnp.dot, preferred_element_type=f32)   # bf16 operands -> single MXU pass

    # Stacked biases (one DMA): rows = [bv | b_sqk | bp_big | bo], zero padded to 128.
    bv = bias_ref[0:1, 0:D]
    b_sqk = bias_ref[1:2, 0:3 * D]
    bp = bias_ref[2:3, 0:num_heads * nongt]
    bo = bias_ref[3:4, 0:D]

    # v_transform: FCNet([v_dim, out_dim]) = Linear + ReLU (all batches at once).
    imp_v = jnp.maximum(dot(v_ref[...], wv_ref[...]) + bv, 0.0)           # [B*N, D] f32

    # Positional bias for every (batch, roi, head, neighbour) with ONE block-structured
    # matmul pos_flat [B*N, M*E] @ Wp_big [M*E, H*M].  HIGHEST because the result feeds
    # log(), which blows bf16 rounding of near-zero values up into large logit errors.
    pos_proj = jnp.dot(pos_ref[...], wp_ref[...],
                       preferred_element_type=f32,
                       precision=jax.lax.Precision.HIGHEST) + bp          # [B*N, H*M]
    log_bias = jnp.log(jnp.maximum(pos_proj, 1e-6))     # == log(max(ReLU(x), 1e-6))

    for _ in range(num_steps):
        # Fused [self_feat | q*(1/sqrt(Dh)) | k] = imp_v @ [Ws | WsWq/s | WsWk] + biases
        # (Ws folded into Wq/Wk and the attention scale folded into the Q branch in
        #  prepare_params): one matmul instead of three dependent ones.
        sqk = dot(imp_v.astype(bf16), wsqk_ref[...]) + b_sqk              # [B*N, 3D] f32
        self_feat = sqk[:, 0:D]
        q_full = sqk[:, D:2 * D]          # already scaled by 1/sqrt(Dh)
        k_full = sqk[:, 2 * D:3 * D]

        o_rows = []
        for b in range(batch):                       # static loop: batch folded into rows
            r0 = b * num_rois
            v_data = self_feat[r0:r0 + nongt, :].astype(bf16)             # [M, D]
            q_b = q_full[r0:r0 + num_rois, :]                             # [N, D]
            k_b = k_full[r0:r0 + nongt, :]                                # [M, D]
            lb_b = log_bias[r0:r0 + num_rois, :]                          # [N, H*M]

            head_outs = []
            for h in range(num_heads):               # static per-head loop
                qh = q_b[:, h * head_dim:(h + 1) * head_dim].astype(bf16)   # [N, Dh]
                kh = k_b[:, h * head_dim:(h + 1) * head_dim].astype(bf16)   # [M, Dh]
                aff = jax.lax.dot_general(qh, kh, (((1,), (1,)), ((), ())),
                                          preferred_element_type=f32)       # [N, M]
                logits = aff + lb_b[:, h * nongt:(h + 1) * nongt]
                # softmax without max-subtraction: logits bounded (log_bias >= -13.8,
                # |aff| small) so exp stays comfortably inside the f32 range.
                e = jnp.exp(logits)
                inv = pl.reciprocal(jnp.sum(e, axis=-1, keepdims=True), approx=True)
                attn = (e * inv).astype(bf16)                               # [N, M]
                head_outs.append(dot(attn, v_data))                         # [N, D]
            o_rows.append(jnp.concatenate(head_outs, axis=1))               # [N, H*D]

        o_stack = jnp.concatenate(o_rows, axis=0).astype(bf16)              # [B*N, H*D]
        # Grouped 1x1 conv + concat fused into ONE block-diagonal matmul + one bias add.
        neighbor = dot(o_stack, wo_ref[...]) + bo                           # [B*N, D]
        gat_out = jnp.maximum(self_feat + neighbor, 0.0)                    # ReLU (dropout = id)
        imp_v = imp_v + gat_out if residual else gat_out

    out_ref[...] = imp_v.astype(out_ref.dtype)


def init_params(key):
    D, H, Dh, E = OUT_DIM, NUM_HEADS, HEAD_DIM, POS_EMB_DIM
    keys = jax.random.split(key, 12)

    def rnd(k, shape, scale):
        return jax.random.normal(k, shape, jnp.float32) * scale

    return dict(
        wv=rnd(keys[0], (V_DIM, D), 1.0 / math.sqrt(V_DIM)), bv=rnd(keys[1], (D,), 0.02),
        ws=rnd(keys[2], (D, D), 1.0 / math.sqrt(D)),          bs=rnd(keys[3], (D,), 0.02),
        wq=rnd(keys[4], (D, D), 1.0 / math.sqrt(D)),          bq=rnd(keys[5], (D,), 0.02),
        wk=rnd(keys[6], (D, D), 1.0 / math.sqrt(D)),          bk=rnd(keys[7], (D,), 0.02),
        wp=rnd(keys[8], (E, H), 1.0 / math.sqrt(E)),          bp=rnd(keys[9], (H,), 0.02),
        # grouped 1x1 conv: weight [out_ch=D, in_ch_per_group=D] (spatial 1x1 dropped)
        wo=rnd(keys[10], (D, D), 1.0 / math.sqrt(D)),         bo=rnd(keys[11], (D,), 0.02),
    )


def prepare_params(p):
    """One-time, host-side parameter preprocessing (hoisted out of the jitted
    forward): weight folding, block-structured layouts, bias stacking and bf16
    pre-casting.  Runs once at init; the per-call forward only reshapes inputs."""
    D, H, Dh, E, M = OUT_DIM, NUM_HEADS, HEAD_DIM, POS_EMB_DIM, NONGT_DIM
    g = lambda a: np.asarray(jax.device_get(a), dtype=np.float32)
    wv, bv = g(p["wv"]), g(p["bv"])
    ws, bs = g(p["ws"]), g(p["bs"])
    wq, bq = g(p["wq"]), g(p["bq"])
    wk, bk = g(p["wk"]), g(p["bk"])
    wp, bp = g(p["wp"]), g(p["bp"])
    wo, bo = g(p["wo"]), g(p["bo"])

    scale = 1.0 / math.sqrt(Dh)
    # Fold Ws into Wq/Wk, and the 1/sqrt(Dh) attention scale into the Q branch.
    w_sqk = np.concatenate([ws, (ws @ wq) * scale, ws @ wk], axis=1)        # [D, 3D]
    b_sqk = np.concatenate([bs, (bs @ wq + bq) * scale, bs @ wk + bk])      # [3D]

    # Positional projection folded into one block-structured [M*E, H*M] matrix:
    #   Wp_big[m*E+e, h*M+m] = wp[e, h]   (zero elsewhere)
    wp_big = np.zeros((M * E, H * M), np.float32)
    for m in range(M):
        for h in range(H):
            wp_big[m * E:(m + 1) * E, h * M + m] = wp[:, h]
    bp_big = np.repeat(bp, M)                                               # [H*M]

    # Grouped 1x1 conv folded into one block-diagonal [H*D, D] matrix:
    #   Wo_bd[h*D+d, h*Dh+j] = wo3[h, d, j]
    wo3 = wo.reshape(H, Dh, D).transpose(0, 2, 1)                           # [H, D, Dh]
    wo_bd = np.zeros((H * D, D), np.float32)
    for h in range(H):
        wo_bd[h * D:(h + 1) * D, h * Dh:(h + 1) * Dh] = wo3[h]

    # Single padded bias block (one DMA instead of six tiny ones).
    bias = np.zeros((4, 128), np.float32)
    bias[0, :D] = bv
    bias[1, :3 * D] = b_sqk
    bias[2, :H * M] = bp_big
    bias[3, :D] = bo

    return dict(
        wv=jnp.asarray(wv, jnp.bfloat16),
        wsqk=jnp.asarray(w_sqk, jnp.bfloat16),
        wp_big=jnp.asarray(wp_big, jnp.float32),   # stays f32: HIGHEST matmul -> log()
        wo_bd=jnp.asarray(wo_bd, jnp.bfloat16),
        bias=jnp.asarray(bias, jnp.float32),
    )


@jax.jit
def relation_encoder_forward(v, position_embedding, prep):
    Bsz, N, v_dim = v.shape
    _, _, M, E = position_embedding.shape
    D, H, Dh = OUT_DIM, NUM_HEADS, HEAD_DIM
    nongt = min(NONGT_DIM, N)
    assert M == nongt and D % H == 0

    # Batch folded into the row dimension; pos flattened to [B*N, M*E].
    v_flat = v.reshape(Bsz * N, v_dim).astype(jnp.bfloat16)
    pos_flat = position_embedding.reshape(Bsz * N, M * E).astype(jnp.float32)

    kernel = partial(_relation_encoder_kernel,
                     batch=Bsz, num_heads=H, head_dim=Dh, nongt=nongt,
                     num_rois=N, out_dim=D, num_steps=NUM_STEPS, residual=RESIDUAL)

    # Single grid-less pallas_call: whole (tiny) arrays live in VMEM, no per-batch
    # pipeline steps.  (On v7x a grid=(B,) with dimension_semantics=("parallel",)
    # could use both TensorCores, but at ~1 us of work the per-step overhead loses.)
    out = pl.pallas_call(
        kernel,
        out_shape=jax.ShapeDtypeStruct((Bsz * N, D), jnp.float32),
    )(v_flat, pos_flat, prep["wv"], prep["wsqk"], prep["wp_big"],
      prep["wo_bd"], prep["bias"])

    return out.reshape(Bsz, N, D)


def relation_encoder_reference(v, pos, p):
    """Pure-JAX reference mirroring the PyTorch forward, at true f32 precision."""
    Bsz, N, _ = v.shape
    _, _, M, E = pos.shape
    D, H, Dh = OUT_DIM, NUM_HEADS, HEAD_DIM
    with jax.default_matmul_precision("float32"):
        imp_v = jax.nn.relu(v @ p["wv"] + p["bv"])
        for _ in range(NUM_STEPS):
            self_feat = imp_v @ p["ws"] + p["bs"]
            v_data = self_feat[:, :M, :]
            q = self_feat @ p["wq"] + p["bq"]
            k = v_data @ p["wk"] + p["bk"]
            qb = q.reshape(Bsz, N, H, Dh).transpose(0, 2, 1, 3)
            kb = k.reshape(Bsz, M, H, Dh).transpose(0, 2, 1, 3)
            aff = jnp.einsum("bhnd,bhmd->bhnm", qb, kb) / math.sqrt(Dh)
            aff = aff.transpose(0, 2, 1, 3)                               # [B,N,H,M]
            pf = pos.reshape(Bsz, N * M, E)
            pf = jax.nn.relu(jnp.einsum("bme,eh->bmh", pf, p["wp"]) + p["bp"])
            pf = pf.reshape(Bsz, N, M, H).transpose(0, 1, 3, 2)           # [B,N,H,M]
            waff = aff + jnp.log(jnp.maximum(pf, 1e-6))
            sm = jax.nn.softmax(waff, axis=3)
            ot = jnp.einsum("bnhm,bmd->bnhd", sm, v_data)                 # [B,N,H,D]
            wo3 = p["wo"].reshape(H, Dh, D).transpose(0, 2, 1)            # [H,D,Dh]
            lo = jnp.einsum("bnhd,hdj->bnhj", ot, wo3).reshape(Bsz, N, D) + p["bo"]
            gat = jax.nn.relu(self_feat + lo)
            imp_v = imp_v + gat if RESIDUAL else gat
    return imp_v


if __name__ == "__main__":
    key = jax.random.PRNGKey(0)
    kp, kv, kpos = jax.random.split(key, 3)
    params = init_params(kp)
    prep = prepare_params(params)          # one-time host-side param preprocessing

    v = jax.random.normal(kv, (B, N_ROIS, V_DIM), jnp.float32)
    position_embedding = jax.random.normal(
        kpos, (B, N_ROIS, NONGT_DIM, POS_EMB_DIM), jnp.float32)

    out = relation_encoder_forward(v, position_embedding, prep)
    out = jax.block_until_ready(out)
    assert out.shape == (B, N_ROIS, OUT_DIM)

    ref = relation_encoder_reference(v, position_embedding, params)
    if not jnp.allclose(out, ref, atol=2e-2, rtol=2e-2):
        raise AssertionError(
            f"kernel/reference mismatch, max abs err = {jnp.max(jnp.abs(out - ref))}")
    print("KERNEL_OK")
</pallas_src>

<mosaic_0001>
module attributes {stable_mosaic.version = 11 : i64} {
  func.func @_relation_encoder_kernel(%arg0: memref<16x48xbf16, #tpu.memory_space<vmem>>, %arg1: memref<16x512xf32, #tpu.memory_space<vmem>>, %arg2: memref<48x32xbf16, #tpu.memory_space<vmem>>, %arg3: memref<32x96xbf16, #tpu.memory_space<vmem>>, %arg4: memref<512x32xf32, #tpu.memory_space<vmem>>, %arg5: memref<128x32xbf16, #tpu.memory_space<vmem>>, %arg6: memref<4x128xf32, #tpu.memory_space<vmem>>, %arg7: memref<16x32xf32, #tpu.memory_space<vmem>>) attributes {dimension_semantics = [], scalar_prefetch = 0 : i64, scratch_operands = 0 : i64, tpu.core_type = #tpu.core_type<tc>} {
    %c0 = arith.constant 0 : index
    %c0_0 = arith.constant 0 : index
    %0 = vector.load %arg6[%c0, %c0_0] : memref<4x128xf32, #tpu.memory_space<vmem>>, vector<1x32xf32>
    %c1 = arith.constant 1 : index
    %c0_1 = arith.constant 0 : index
    %1 = vector.load %arg6[%c1, %c0_1] : memref<4x128xf32, #tpu.memory_space<vmem>>, vector<1x96xf32>
    %c2 = arith.constant 2 : index
    %c0_2 = arith.constant 0 : index
    %2 = vector.load %arg6[%c2, %c0_2] : memref<4x128xf32, #tpu.memory_space<vmem>>, vector<1x32xf32>
    %c3 = arith.constant 3 : index
    %c0_3 = arith.constant 0 : index
    %3 = vector.load %arg6[%c3, %c0_3] : memref<4x128xf32, #tpu.memory_space<vmem>>, vector<1x32xf32>
    %c0_4 = arith.constant 0 : index
    %c0_5 = arith.constant 0 : index
    %4 = vector.load %arg0[%c0_4, %c0_5] : memref<16x48xbf16, #tpu.memory_space<vmem>>, vector<16x48xbf16>
    %c0_6 = arith.constant 0 : index
    %c0_7 = arith.constant 0 : index
    %5 = vector.load %arg2[%c0_6, %c0_7] : memref<48x32xbf16, #tpu.memory_space<vmem>>, vector<48x32xbf16>
    %cst = arith.constant dense<0.000000e+00> : vector<16x32xf32>
    %6 = tpu.matmul %4, %5, %cst {dimension_numbers = #tpu.dot_dimension_numbers<[1], [0], [0], [1], [0, 0, 1, 1], [], []>} : vector<16x48xbf16>, vector<48x32xbf16>, vector<16x32xf32> -> vector<16x32xf32>
    %7 = vector.broadcast %0 : vector<1x32xf32> to vector<16x32xf32>
    %8 = arith.addf %6, %7 : vector<16x32xf32>
    %cst_8 = arith.constant 0.000000e+00 : f32
    %9 = vector.broadcast %cst_8 : f32 to vector<16x32xf32>
    %10 = arith.maximumf %8, %9 : vector<16x32xf32>
    %c0_9 = arith.constant 0 : index
    %c0_10 = arith.constant 0 : index
    %11 = vector.load %arg1[%c0_9, %c0_10] : memref<16x512xf32, #tpu.memory_space<vmem>>, vector<16x512xf32>
    %c0_11 = arith.constant 0 : index
    %c0_12 = arith.constant 0 : index
    %12 = vector.load %arg4[%c0_11, %c0_12] : memref<512x32xf32, #tpu.memory_space<vmem>>, vector<512x32xf32>
    %cst_13 = arith.constant dense<0.000000e+00> : vector<16x32xf32>
    %13 = tpu.matmul %11, %12, %cst_13 {dimension_numbers = #tpu.dot_dimension_numbers<[1], [0], [0], [1], [0, 0, 1, 1], [], []>, precision = #tpu.contract_precision<fp32>} : vector<16x512xf32>, vector<512x32xf32>, vector<16x32xf32> -> vector<16x32xf32>
    %14 = vector.broadcast %2 : vector<1x32xf32> to vector<16x32xf32>
    %15 = arith.addf %13, %14 : vector<16x32xf32>
    %cst_14 = arith.constant 9.99999997E-7 : f32
    %16 = vector.broadcast %cst_14 : f32 to vector<16x32xf32>
    %17 = arith.maximumf %15, %16 : vector<16x32xf32>
    %18 = math.log %17 : vector<16x32xf32>
    %19 = arith.truncf %10 : vector<16x32xf32> to vector<16x32xbf16>
    %c0_15 = arith.constant 0 : index
    %c0_16 = arith.constant 0 : index
    %20 = vector.load %arg3[%c0_15, %c0_16] : memref<32x96xbf16, #tpu.memory_space<vmem>>, vector<32x96xbf16>
    %cst_17 = arith.constant dense<0.000000e+00> : vector<16x96xf32>
    %21 = tpu.matmul %19, %20, %cst_17 {dimension_numbers = #tpu.dot_dimension_numbers<[1], [0], [0], [1], [0, 0, 1, 1], [], []>} : vector<16x32xbf16>, vector<32x96xbf16>, vector<16x96xf32> -> vector<16x96xf32>
    %22 = vector.broadcast %1 : vector<1x96xf32> to vector<16x96xf32>
    %23 = arith.addf %21, %22 : vector<16x96xf32>
    %24 = vector.extract_strided_slice %23 {offsets = [0, 0], sizes = [16, 32], strides = [1, 1]} : vector<16x96xf32> to vector<16x32xf32>
    %25 = vector.extract_strided_slice %23 {offsets = [0, 32], sizes = [16, 32], strides = [1, 1]} : vector<16x96xf32> to vector<16x32xf32>
    %26 = vector.extract_strided_slice %23 {offsets = [0, 64], sizes = [16, 32], strides = [1, 1]} : vector<16x96xf32> to vector<16x32xf32>
    %27 = vector.extract_strided_slice %24 {offsets = [0, 0], sizes = [8, 32], strides = [1, 1]} : vector<16x32xf32> to vector<8x32xf32>
    %28 = arith.truncf %27 : vector<8x32xf32> to vector<8x32xbf16>
    %29 = vector.extract_strided_slice %25 {offsets = [0, 0], sizes = [8, 32], strides = [1, 1]} : vector<16x32xf32> to vector<8x32xf32>
    %30 = vector.extract_strided_slice %26 {offsets = [0, 0], sizes = [8, 32], strides = [1, 1]} : vector<16x32xf32> to vector<8x32xf32>
    %31 = vector.extract_strided_slice %18 {offsets = [0, 0], sizes = [8, 32], strides = [1, 1]} : vector<16x32xf32> to vector<8x32xf32>
    %32 = vector.extract_strided_slice %29 {offsets = [0, 0], sizes = [8, 8], strides = [1, 1]} : vector<8x32xf32> to vector<8x8xf32>
    %33 = arith.truncf %32 : vector<8x8xf32> to vector<8x8xbf16>
    %34 = vector.extract_strided_slice %30 {offsets = [0, 0], sizes = [8, 8], strides = [1, 1]} : vector<8x32xf32> to vector<8x8xf32>
    %35 = arith.truncf %34 : vector<8x8xf32> to vector<8x8xbf16>
    %cst_18 = arith.constant dense<0.000000e+00> : vector<8x8xf32>
    %36 = tpu.matmul %33, %35, %cst_18 {dimension_numbers = #tpu.dot_dimension_numbers<[1], [1], [0], [0], [0, 0, 1, 0], [], []>} : vector<8x8xbf16>, vector<8x8xbf16>, vector<8x8xf32> -> vector<8x8xf32>
    %37 = vector.extract_strided_slice %31 {offsets = [0, 0], sizes = [8, 8], strides = [1, 1]} : vector<8x32xf32> to vector<8x8xf32>
    %38 = arith.addf %36, %37 : vector<8x8xf32>
    %39 = math.exp %38 : vector<8x8xf32>
    %cst_19 = arith.constant dense<0.000000e+00> : vector<8xf32>
    %40 = vector.multi_reduction <add>, %39, %cst_19 [1] : vector<8x8xf32> to vector<8xf32>
    %41 = vector.shape_cast %40 : vector<8xf32> to vector<8x1xf32>
    %42 = tpu.reciprocal %41 {approx = true} : vector<8x1xf32> -> vector<8x1xf32>
    %43 = vector.broadcast %42 : vector<8x1xf32> to vector<8x8xf32>
    %44 = arith.mulf %39, %43 : vector<8x8xf32>
    %45 = arith.truncf %44 : vector<8x8xf32> to vector<8x8xbf16>
    %cst_20 = arith.constant dense<0.000000e+00> : vector<8x32xf32>
    %46 = tpu.matmul %45, %28, %cst_20 {dimension_numbers = #tpu.dot_dimension_numbers<[1], [0], [0], [1], [0, 0, 1, 1], [], []>} : vector<8x8xbf16>, vector<8x32xbf16>, vector<8x32xf32> -> vector<8x32xf32>
    %47 = vector.extract_strided_slice %29 {offsets = [0, 8], sizes = [8, 8], strides = [1, 1]} : vector<8x32xf32> to vector<8x8xf32>
    %48 = arith.truncf %47 : vector<8x8xf32> to vector<8x8xbf16>
    %49 = vector.extract_strided_slice %30 {offsets = [0, 8], sizes = [8, 8], strides = [1, 1]} : vector<8x32xf32> to vector<8x8xf32>
    %50 = arith.truncf %49 : vector<8x8xf32> to vector<8x8xbf16>
    %cst_21 = arith.constant dense<0.000000e+00> : vector<8x8xf32>
    %51 = tpu.matmul %48, %50, %cst_21 {dimension_numbers = #tpu.dot_dimension_numbers<[1], [1], [0], [0], [0, 0, 1, 0], [], []>} : vector<8x8xbf16>, vector<8x8xbf16>, vector<8x8xf32> -> vector<8x8xf32>
    %52 = vector.extract_strided_slice %31 {offsets = [0, 8], sizes = [8, 8], strides = [1, 1]} : vector<8x32xf32> to vector<8x8xf32>
    %53 = arith.addf %51, %52 : vector<8x8xf32>
    %54 = math.exp %53 : vector<8x8xf32>
    %cst_22 = arith.constant dense<0.000000e+00> : vector<8xf32>
    %55 = vector.multi_reduction <add>, %54, %cst_22 [1] : vector<8x8xf32> to vector<8xf32>
    %56 = vector.shape_cast %55 : vector<8xf32> to vector<8x1xf32>
    %57 = tpu.reciprocal %56 {approx = true} : vector<8x1xf32> -> vector<8x1xf32>
    %58 = vector.broadcast %57 : vector<8x1xf32> to vector<8x8xf32>
    %59 = arith.mulf %54, %58 : vector<8x8xf32>
    %60 = arith.truncf %59 : vector<8x8xf32> to vector<8x8xbf16>
    %cst_23 = arith.constant dense<0.000000e+00> : vector<8x32xf32>
    %61 = tpu.matmul %60, %28, %cst_23 {dimension_numbers = #tpu.dot_dimension_numbers<[1], [0], [0], [1], [0, 0, 1, 1], [], []>} : vector<8x8xbf16>, vector<8x32xbf16>, vector<8x32xf32> -> vector<8x32xf32>
    %62 = vector.extract_strided_slice %29 {offsets = [0, 16], sizes = [8, 8], strides = [1, 1]} : vector<8x32xf32> to vector<8x8xf32>
    %63 = arith.truncf %62 : vector<8x8xf32> to vector<8x8xbf16>
    %64 = vector.extract_strided_slice %30 {offsets = [0, 16], sizes = [8, 8], strides = [1, 1]} : vector<8x32xf32> to vector<8x8xf32>
    %65 = arith.truncf %64 : vector<8x8xf32> to vector<8x8xbf16>
    %cst_24 = arith.constant dense<0.000000e+00> : vector<8x8xf32>
    %66 = tpu.matmul %63, %65, %cst_24 {dimension_numbers = #tpu.dot_dimension_numbers<[1], [1], [0], [0], [0, 0, 1, 0], [], []>} : vector<8x8xbf16>, vector<8x8xbf16>, vector<8x8xf32> -> vector<8x8xf32>
    %67 = vector.extract_strided_slice %31 {offsets = [0, 16], sizes = [8, 8], strides = [1, 1]} : vector<8x32xf32> to vector<8x8xf32>
    %68 = arith.addf %66, %67 : vector<8x8xf32>
    %69 = math.exp %68 : vector<8x8xf32>
    %cst_25 = arith.constant dense<0.000000e+00> : vector<8xf32>
    %70 = vector.multi_reduction <add>, %69, %cst_25 [1] : vector<8x8xf32> to vector<8xf32>
    %71 = vector.shape_cast %70 : vector<8xf32> to vector<8x1xf32>
    %72 = tpu.reciprocal %71 {approx = true} : vector<8x1xf32> -> vector<8x1xf32>
    %73 = vector.broadcast %72 : vector<8x1xf32> to vector<8x8xf32>
    %74 = arith.mulf %69, %73 : vector<8x8xf32>
    %75 = arith.truncf %74 : vector<8x8xf32> to vector<8x8xbf16>
    %cst_26 = arith.constant dense<0.000000e+00> : vector<8x32xf32>
    %76 = tpu.matmul %75, %28, %cst_26 {dimension_numbers = #tpu.dot_dimension_numbers<[1], [0], [0], [1], [0, 0, 1, 1], [], []>} : vector<8x8xbf16>, vector<8x32xbf16>, vector<8x32xf32> -> vector<8x32xf32>
    %77 = vector.extract_strided_slice %29 {offsets = [0, 24], sizes = [8, 8], strides = [1, 1]} : vector<8x32xf32> to vector<8x8xf32>
    %78 = arith.truncf %77 : vector<8x8xf32> to vector<8x8xbf16>
    %79 = vector.extract_strided_slice %30 {offsets = [0, 24], sizes = [8, 8], strides = [1, 1]} : vector<8x32xf32> to vector<8x8xf32>
    %80 = arith.truncf %79 : vector<8x8xf32> to vector<8x8xbf16>
    %cst_27 = arith.constant dense<0.000000e+00> : vector<8x8xf32>
    %81 = tpu.matmul %78, %80, %cst_27 {dimension_numbers = #tpu.dot_dimension_numbers<[1], [1], [0], [0], [0, 0, 1, 0], [], []>} : vector<8x8xbf16>, vector<8x8xbf16>, vector<8x8xf32> -> vector<8x8xf32>
    %82 = vector.extract_strided_slice %31 {offsets = [0, 24], sizes = [8, 8], strides = [1, 1]} : vector<8x32xf32> to vector<8x8xf32>
    %83 = arith.addf %81, %82 : vector<8x8xf32>
    %84 = math.exp %83 : vector<8x8xf32>
    %cst_28 = arith.constant dense<0.000000e+00> : vector<8xf32>
    %85 = vector.multi_reduction <add>, %84, %cst_28 [1] : vector<8x8xf32> to vector<8xf32>
    %86 = vector.shape_cast %85 : vector<8xf32> to vector<8x1xf32>
    %87 = tpu.reciprocal %86 {approx = true} : vector<8x1xf32> -> vector<8x1xf32>
    %88 = vector.broadcast %87 : vector<8x1xf32> to vector<8x8xf32>
    %89 = arith.mulf %84, %88 : vector<8x8xf32>
    %90 = arith.truncf %89 : vector<8x8xf32> to vector<8x8xbf16>
    %cst_29 = arith.constant dense<0.000000e+00> : vector<8x32xf32>
    %91 = tpu.matmul %90, %28, %cst_29 {dimension_numbers = #tpu.dot_dimension_numbers<[1], [0], [0], [1], [0, 0, 1, 1], [], []>} : vector<8x8xbf16>, vector<8x32xbf16>, vector<8x32xf32> -> vector<8x32xf32>
    %92 = tpu.concatenate %46, %61, %76, %91 in 1 : vector<8x32xf32>, vector<8x32xf32>, vector<8x32xf32>, vector<8x32xf32> -> vector<8x128xf32>
    %93 = vector.extract_strided_slice %24 {offsets = [8, 0], sizes = [8, 32], strides = [1, 1]} : vector<16x32xf32> to vector<8x32xf32>
    %94 = arith.truncf %93 : vector<8x32xf32> to vector<8x32xbf16>
    %95 = vector.extract_strided_slice %25 {offsets = [8, 0], sizes = [8, 32], strides = [1, 1]} : vector<16x32xf32> to vector<8x32xf32>
    %96 = vector.extract_strided_slice %26 {offsets = [8, 0], sizes = [8, 32], strides = [1, 1]} : vector<16x32xf32> to vector<8x32xf32>
    %97 = vector.extract_strided_slice %18 {offsets = [8, 0], sizes = [8, 32], strides = [1, 1]} : vector<16x32xf32> to vector<8x32xf32>
    %98 = vector.extract_strided_slice %95 {offsets = [0, 0], sizes = [8, 8], strides = [1, 1]} : vector<8x32xf32> to vector<8x8xf32>
    %99 = arith.truncf %98 : vector<8x8xf32> to vector<8x8xbf16>
    %100 = vector.extract_strided_slice %96 {offsets = [0, 0], sizes = [8, 8], strides = [1, 1]} : vector<8x32xf32> to vector<8x8xf32>
    %101 = arith.truncf %100 : vector<8x8xf32> to vector<8x8xbf16>
    %cst_30 = arith.constant dense<0.000000e+00> : vector<8x8xf32>
    %102 = tpu.matmul %99, %101, %cst_30 {dimension_numbers = #tpu.dot_dimension_numbers<[1], [1], [0], [0], [0, 0, 1, 0], [], []>} : vector<8x8xbf16>, vector<8x8xbf16>, vector<8x8xf32> -> vector<8x8xf32>
    %103 = vector.extract_strided_slice %97 {offsets = [0, 0], sizes = [8, 8], strides = [1, 1]} : vector<8x32xf32> to vector<8x8xf32>
    %104 = arith.addf %102, %103 : vector<8x8xf32>
    %105 = math.exp %104 : vector<8x8xf32>
    %cst_31 = arith.constant dense<0.000000e+00> : vector<8xf32>
    %106 = vector.multi_reduction <add>, %105, %cst_31 [1] : vector<8x8xf32> to vector<8xf32>
    %107 = vector.shape_cast %106 : vector<8xf32> to vector<8x1xf32>
    %108 = tpu.reciprocal %107 {approx = true} : vector<8x1xf32> -> vector<8x1xf32>
    %109 = vector.broadcast %108 : vector<8x1xf32> to vector<8x8xf32>
    %110 = arith.mulf %105, %109 : vector<8x8xf32>
    %111 = arith.truncf %110 : vector<8x8xf32> to vector<8x8xbf16>
    %cst_32 = arith.constant dense<0.000000e+00> : vector<8x32xf32>
    %112 = tpu.matmul %111, %94, %cst_32 {dimension_numbers = #tpu.dot_dimension_numbers<[1], [0], [0], [1], [0, 0, 1, 1], [], []>} : vector<8x8xbf16>, vector<8x32xbf16>, vector<8x32xf32> -> vector<8x32xf32>
    %113 = vector.extract_strided_slice %95 {offsets = [0, 8], sizes = [8, 8], strides = [1, 1]} : vector<8x32xf32> to vector<8x8xf32>
    %114 = arith.truncf %113 : vector<8x8xf32> to vector<8x8xbf16>
    %115 = vector.extract_strided_slice %96 {offsets = [0, 8], sizes = [8, 8], strides = [1, 1]} : vector<8x32xf32> to vector<8x8xf32>
    %116 = arith.truncf %115 : vector<8x8xf32> to vector<8x8xbf16>
    %cst_33 = arith.constant dense<0.000000e+00> : vector<8x8xf32>
    %117 = tpu.matmul %114, %116, %cst_33 {dimension_numbers = #tpu.dot_dimension_numbers<[1], [1], [0], [0], [0, 0, 1, 0], [], []>} : vector<8x8xbf16>, vector<8x8xbf16>, vector<8x8xf32> -> vector<8x8xf32>
    %118 = vector.extract_strided_slice %97 {offsets = [0, 8], sizes = [8, 8], strides = [1, 1]} : vector<8x32xf32> to vector<8x8xf32>
    %119 = arith.addf %117, %118 : vector<8x8xf32>
    %120 = math.exp %119 : vector<8x8xf32>
    %cst_34 = arith.constant dense<0.000000e+00> : vector<8xf32>
    %121 = vector.multi_reduction <add>, %120, %cst_34 [1] : vector<8x8xf32> to vector<8xf32>
    %122 = vector.shape_cast %121 : vector<8xf32> to vector<8x1xf32>
    %123 = tpu.reciprocal %122 {approx = true} : vector<8x1xf32> -> vector<8x1xf32>
    %124 = vector.broadcast %123 : vector<8x1xf32> to vector<8x8xf32>
    %125 = arith.mulf %120, %124 : vector<8x8xf32>
    %126 = arith.truncf %125 : vector<8x8xf32> to vector<8x8xbf16>
    %cst_35 = arith.constant dense<0.000000e+00> : vector<8x32xf32>
    %127 = tpu.matmul %126, %94, %cst_35 {dimension_numbers = #tpu.dot_dimension_numbers<[1], [0], [0], [1], [0, 0, 1, 1], [], []>} : vector<8x8xbf16>, vector<8x32xbf16>, vector<8x32xf32> -> vector<8x32xf32>
    %128 = vector.extract_strided_slice %95 {offsets = [0, 16], sizes = [8, 8], strides = [1, 1]} : vector<8x32xf32> to vector<8x8xf32>
    %129 = arith.truncf %128 : vector<8x8xf32> to vector<8x8xbf16>
    %130 = vector.extract_strided_slice %96 {offsets = [0, 16], sizes = [8, 8], strides = [1, 1]} : vector<8x32xf32> to vector<8x8xf32>
    %131 = arith.truncf %130 : vector<8x8xf32> to vector<8x8xbf16>
    %cst_36 = arith.constant dense<0.000000e+00> : vector<8x8xf32>
    %132 = tpu.matmul %129, %131, %cst_36 {dimension_numbers = #tpu.dot_dimension_numbers<[1], [1], [0], [0], [0, 0, 1, 0], [], []>} : vector<8x8xbf16>, vector<8x8xbf16>, vector<8x8xf32> -> vector<8x8xf32>
    %133 = vector.extract_strided_slice %97 {offsets = [0, 16], sizes = [8, 8], strides = [1, 1]} : vector<8x32xf32> to vector<8x8xf32>
    %134 = arith.addf %132, %133 : vector<8x8xf32>
    %135 = math.exp %134 : vector<8x8xf32>
    %cst_37 = arith.constant dense<0.000000e+00> : vector<8xf32>
    %136 = vector.multi_reduction <add>, %135, %cst_37 [1] : vector<8x8xf32> to vector<8xf32>
    %137 = vector.shape_cast %136 : vector<8xf32> to vector<8x1xf32>
    %138 = tpu.reciprocal %137 {approx = true} : vector<8x1xf32> -> vector<8x1xf32>
    %139 = vector.broadcast %138 : vector<8x1xf32> to vector<8x8xf32>
    %140 = arith.mulf %135, %139 : vector<8x8xf32>
    %141 = arith.truncf %140 : vector<8x8xf32> to vector<8x8xbf16>
    %cst_38 = arith.constant dense<0.000000e+00> : vector<8x32xf32>
    %142 = tpu.matmul %141, %94, %cst_38 {dimension_numbers = #tpu.dot_dimension_numbers<[1], [0], [0], [1], [0, 0, 1, 1], [], []>} : vector<8x8xbf16>, vector<8x32xbf16>, vector<8x32xf32> -> vector<8x32xf32>
    %143 = vector.extract_strided_slice %95 {offsets = [0, 24], sizes = [8, 8], strides = [1, 1]} : vector<8x32xf32> to vector<8x8xf32>
    %144 = arith.truncf %143 : vector<8x8xf32> to vector<8x8xbf16>
    %145 = vector.extract_strided_slice %96 {offsets = [0, 24], sizes = [8, 8], strides = [1, 1]} : vector<8x32xf32> to vector<8x8xf32>
    %146 = arith.truncf %145 : vector<8x8xf32> to vector<8x8xbf16>
    %cst_39 = arith.constant dense<0.000000e+00> : vector<8x8xf32>
    %147 = tpu.matmul %144, %146, %cst_39 {dimension_numbers = #tpu.dot_dimension_numbers<[1], [1], [0], [0], [0, 0, 1, 0], [], []>} : vector<8x8xbf16>, vector<8x8xbf16>, vector<8x8xf32> -> vector<8x8xf32>
    %148 = vector.extract_strided_slice %97 {offsets = [0, 24], sizes = [8, 8], strides = [1, 1]} : vector<8x32xf32> to vector<8x8xf32>
    %149 = arith.addf %147, %148 : vector<8x8xf32>
    %150 = math.exp %149 : vector<8x8xf32>
    %cst_40 = arith.constant dense<0.000000e+00> : vector<8xf32>
    %151 = vector.multi_reduction <add>, %150, %cst_40 [1] : vector<8x8xf32> to vector<8xf32>
    %152 = vector.shape_cast %151 : vector<8xf32> to vector<8x1xf32>
    %153 = tpu.reciprocal %152 {approx = true} : vector<8x1xf32> -> vector<8x1xf32>
    %154 = vector.broadcast %153 : vector<8x1xf32> to vector<8x8xf32>
    %155 = arith.mulf %150, %154 : vector<8x8xf32>
    %156 = arith.truncf %155 : vector<8x8xf32> to vector<8x8xbf16>
    %cst_41 = arith.constant dense<0.000000e+00> : vector<8x32xf32>
    %157 = tpu.matmul %156, %94, %cst_41 {dimension_numbers = #tpu.dot_dimension_numbers<[1], [0], [0], [1], [0, 0, 1, 1], [], []>} : vector<8x8xbf16>, vector<8x32xbf16>, vector<8x32xf32> -> vector<8x32xf32>
    %158 = tpu.concatenate %112, %127, %142, %157 in 1 : vector<8x32xf32>, vector<8x32xf32>, vector<8x32xf32>, vector<8x32xf32> -> vector<8x128xf32>
    %159 = tpu.concatenate %92, %158 in 0 : vector<8x128xf32>, vector<8x128xf32> -> vector<16x128xf32>
    %160 = arith.truncf %159 : vector<16x128xf32> to vector<16x128xbf16>
    %c0_42 = arith.constant 0 : index
    %c0_43 = arith.constant 0 : index
    %161 = vector.load %arg5[%c0_42, %c0_43] : memref<128x32xbf16, #tpu.memory_space<vmem>>, vector<128x32xbf16>
    %cst_44 = arith.constant dense<0.000000e+00> : vector<16x32xf32>
    %162 = tpu.matmul %160, %161, %cst_44 {dimension_numbers = #tpu.dot_dimension_numbers<[1], [0], [0], [1], [0, 0, 1, 1], [], []>} : vector<16x128xbf16>, vector<128x32xbf16>, vector<16x32xf32> -> vector<16x32xf32>
    %163 = vector.broadcast %3 : vector<1x32xf32> to vector<16x32xf32>
    %164 = arith.addf %162, %163 : vector<16x32xf32>
    %165 = arith.addf %24, %164 : vector<16x32xf32>
    %cst_45 = arith.constant 0.000000e+00 : f32
    %166 = vector.broadcast %cst_45 : f32 to vector<16x32xf32>
    %167 = arith.maximumf %165, %166 : vector<16x32xf32>
    %168 = arith.addf %10, %167 : vector<16x32xf32>
    %c0_46 = arith.constant 0 : index
    %c0_47 = arith.constant 0 : index
    %169 = vector.load %arg7[%c0_46, %c0_47] : memref<16x32xf32, #tpu.memory_space<vmem>>, vector<16x32xf32>
    tpu.vector_store %arg7[%c0_46, %c0_47], %168 {strides = array<i32>} : memref<16x32xf32, #tpu.memory_space<vmem>>, vector<16x32xf32>,
    return
  }
}

</mosaic_0001>

<bundles_post_ra>
// kernel: relation_encoder_forward.1
= control target key start
LH: loop header
LB: loop body
LE: loop exit
PB: predicated region body
PF: predicated region fallthrough
CT: control target
= control target key end

     0   :  { %s3938_s0 = inlined_call_operand.vmem [shape: bf16[16,48], index: 0, kind: input, shape index: {}]   ;;  %s3939_s1 = inlined_call_operand.vmem [shape: f32[16,512], index: 1, kind: input, shape index: {}]   ;;  %s3940_s2 = inlined_call_operand.vmem [shape: bf16[48,32], index: 2, kind: input, shape index: {}]   ;;  %s3941_s3 = inlined_call_operand.vmem [shape: bf16[32,96], index: 3, kind: input, shape index: {}]   ;;  %s3942_s4 = inlined_call_operand.vmem [shape: f32[512,32], index: 4, kind: input, shape index: {}]   ;;  %s3943_s5 = inlined_call_operand.vmem [shape: bf16[128,32], index: 5, kind: input, shape index: {}]   ;;  %s3944_s6 = inlined_call_operand.vmem [shape: f32[4,128], index: 6, kind: input, shape index: {}]   ;;  %s3945_s7 = inlined_call_operand.hbm [shape: f32[16,32], index: 7, kind: output, shape index: {}]  }
   0x1   :  { %v107_v0 = vld [vmem:[%s3942_s4 + $0x78] sm:$0xff]  ;;  %v106_v1 = vld [vmem:[%s3942_s4 + $0x70] sm:$0xff]  ;;  %v105_v2 = vld [vmem:[%s3942_s4 + $0x68] sm:$0xff] }
   0x2   :  { %v2481_v3 = vand.u32 4294901760, %v107_v0  ;;  %v2483_v4 = vand.u32 4294901760, %v106_v1  ;;  %v2485_v5 = vand.u32 4294901760, %v105_v2  ;;  %v104_v6 = vld [vmem:[%s3942_s4 + $0x60] sm:$0xff]  ;;  %v103_v7 = vld [vmem:[%s3942_s4 + $0x58] sm:$0xff]  ;;  %v2310_v8 = vld [vmem:[%s3940_s2 + $0x10] sm:$0xff] }
   0x3   :  { %v2496_v9 = vand.u32 4294901760, %v104_v6  ;;  %v2498_v10 = vand.u32 4294901760, %v103_v7  ;;  %v102_v11 = vld [vmem:[%s3942_s4 + $0x50] sm:$0xff]  ;;  %v101_v12 = vld [vmem:[%s3942_s4 + $0x48] sm:$0xff]  ;;  %73 = vmatpush.bf16.msra.mxu0 %v2310_v8  ;;  %v100_v17 = vld [vmem:[%s3942_s4 + $0x40] sm:$0xff] }
   0x4   :  { %158 = vmatpush.msra.mxu1 %v2481_v3  ;;  %v2508_v13 = vsub.f32 %v107_v0, %v2481_v3  ;;  %v2510_v14 = vand.u32 4294901760, %v102_v11  ;;  %v2513_v15 = vsub.f32 %v106_v1, %v2483_v4  ;;  %v2515_v16 = vand.u32 4294901760, %v101_v12  ;;  %v99_v18 = vld [vmem:[%s3942_s4 + $0x38] sm:$0xff]  ;;  %v2309_v20 = vld [vmem:[%s3940_s2 + $0x8] sm:$0xff]  ;;  %v98_v29 = vld [vmem:[%s3942_s4 + $0x30] sm:$0xff] }
   0x5   :  { %v2524_v19 = vsub.f32 %v105_v2, %v2485_v5  ;;  %v2530_v21 = vsub.f32 %v104_v6, %v2496_v9  ;;  %v2536_v24 = vand.u32 4294901760, %v100_v17  ;;  %v2539_v25 = vsub.f32 %v103_v7, %v2498_v10  ;;  %v2308_v34 = vld [vmem:[%s3940_s2] sm:$0xff]  ;;  %v97_v38 = vld [vmem:[%s3942_s4 + $0x28] sm:$0xff] }
   0x6   :  { %160 = vmatpush.msra.mxu1 %v2483_v4  ;;  %v208_v22 = vand.u32 4294901760, %v2508_v13  ;;  %v214_v23 = vand.u32 4294901760, %v2513_v15  ;;  %313 = vmatpush.msra.mxu3 %v2508_v13  ;;  %v2543_v28 = vand.u32 4294901760, %v99_v18  ;;  %v2549_v30 = vsub.f32 %v102_v11, %v2510_v14 }
   0x7   :  { %v220_v26 = vand.u32 4294901760, %v2524_v19  ;;  %v226_v27 = vand.u32 4294901760, %v2530_v21  ;;  %v232_v33 = vand.u32 4294901760, %v2539_v25  ;;  %v2564_v35 = vsub.f32 %v101_v12, %v2515_v16  ;;  %74 = vmatpush.bf16.msra.mxu0 %v2309_v20 }
   0x8   :  { %162 = vmatpush.msra.mxu1 %v2485_v5  ;;  %v209_v31 = vsub.f32 %v2508_v13, %v208_v22  ;;  %v215_v32 = vsub.f32 %v2513_v15, %v214_v23  ;;  %316 = vmatpush.msra.mxu3 %v2513_v15  ;;  %v238_v37 = vand.u32 4294901760, %v2549_v30 }
   0x9   :  { %v221_v36 = vsub.f32 %v2524_v19, %v220_v26 }
   0xa   :  { %12 = vsyncpa [#allocation3], 0  ;;  %164 = vmatpush.msra.mxu1 %v2496_v9  ;;  %v210_v39 = vand.u32 4294901760, %v209_v31  ;;  %v216_v40 = vand.u32 4294901760, %v215_v32  ;;  %v227_v41 = vsub.f32 %v2530_v21, %v226_v27  ;;  %319 = vmatpush.msra.mxu3 %v2524_v19  ;;  %v2578_v42 = vand.u32 4294901760, %v98_v29  ;;  %v96_v44 = vld [vmem:[%s3942_s4 + $0x20] sm:$0xff] }
   0xb   :  { %v244_v43 = vand.u32 4294901760, %v2564_v35  ;;  %v2585_v45 = vsub.f32 %v100_v17, %v2536_v24  ;;  %v222_v46 = vand.u32 4294901760, %v221_v36  ;;  %v233_v47 = vsub.f32 %v2539_v25, %v232_v33  ;;  %75 = vmatpush.bf16.msra.mxu0 %v2308_v34  ;;  %v95_v51 = vld [vmem:[%s3942_s4 + $0x18] sm:$0xff]  ;;  %v94_v57 = vld [vmem:[%s3942_s4 + $0x10] sm:$0xff]  ;;  %v93_v63 = vld [vmem:[%s3942_s4 + $0x8] sm:$0xff]  ;;  %s2417_s11 = smov 88  }
   0xc   :  { %166 = vmatpush.msra.mxu1 %v2498_v10  ;;  %211 = vmatpush.msra.mxu2 %v210_v39  ;;  %v2591_v48 = vand.u32 4294901760, %v97_v38  ;;  %v2594_v49 = vsub.f32 %v99_v18, %v2543_v28  ;;  %v239_v50 = vsub.f32 %v2549_v30, %v238_v37  ;;  %v228_v52 = vand.u32 4294901760, %v227_v41  ;;  %v92_v6 = vld [vmem:[%s3942_s4] sm:$0xff]  ;;  %v119_v13 = vld [vmem:[%s3942_s4 + $0xd8] sm:$0xff]  ;;  %s2418_s12 = smov 56   ;;  %s2419_s13 = smov 64  }
   0xd   :  { %322 = vmatpush.msra.mxu3 %v2530_v21  ;;  %v2604_v53 = vand.u32 4294901760, %v96_v44  ;;  %v250_v54 = vand.u32 4294901760, %v2585_v45  ;;  %v2608_v55 = vsub.f32 %v98_v29, %v2578_v42  ;;  %v245_v56 = vsub.f32 %v2564_v35, %v244_v43  ;;  %v2307_v21 = vld [vmem:[%s3938_s0] sm:$0xff]  ;;  %s2420_s14 = smov 80   ;;  %s2421_s15 = smov 48  }
   0xe   :  { %168 = vmatpush.msra.mxu1 %v2510_v14  ;;  %217 = vmatpush.msra.mxu2 %v216_v40  ;;  %v234_v58 = vand.u32 4294901760, %v233_v47  ;;  %v2619_v59 = vand.u32 4294901760, %v95_v51  ;;  %v256_v60 = vand.u32 4294901760, %v2594_v49  ;;  %v2623_v61 = vsub.f32 %v97_v38, %v2591_v48  ;;  %s2422_s16 = smov 96   ;;  %s2423_s17 = smov 72  }
   0xf   :  { %325 = vmatpush.msra.mxu3 %v2539_v25  ;;  %371 = vmatpush.msrb.mxu0 %v2481_v3  ;;  %v240_v62 = vand.u32 4294901760, %v239_v50  ;;  %v251_v0 = vsub.f32 %v2585_v45, %v250_v54  ;;  %v2634_v1 = vand.u32 4294901760, %v94_v57  ;;  %v262_v2 = vand.u32 4294901760, %v2608_v55  ;;  %v123_v50 = vld [vmem:[%s3942_s4 + $0xf8] sm:$0xff]  ;;  %s2424_s18 = smov 40   ;;  %s2425_s19 = smov 112  }
  0x10   :  { %170 = vmatpush.msra.mxu1 %v2515_v16  ;;  %223 = vmatpush.msra.mxu2 %v222_v46  ;;  %v2641_v7 = vsub.f32 %v96_v44, %v2604_v53  ;;  %v246_v8 = vand.u32 4294901760, %v245_v56  ;;  %v257_v11 = vsub.f32 %v2594_v49, %v256_v60  ;;  %v2649_v12 = vand.u32 4294901760, %v93_v63  ;;  %s2426_s20 = smov 120   ;;  %s2427_s21 = smov 104  }
  0x11   :  { %328 = vmatpush.msra.mxu3 %v2549_v30  ;;  %373 = vmatpush.msrb.mxu0 %v2483_v4  ;;  %v268_v17 = vand.u32 4294901760, %v2623_v61  ;;  %v2653_v18 = vsub.f32 %v95_v51, %v2619_v59  ;;  %v2657_v20 = vand.u32 4294901760, %v92_v6  ;;  %v252_v29 = vand.u32 4294901760, %v251_v0  ;;  %s2428_s22 = smov 32  }
  0x12   :  { %172 = vmatpush.msra.mxu1 %v2536_v24  ;;  %229 = vmatpush.msra.mxu2 %v228_v52  ;;  %v263_v31 = vsub.f32 %v2608_v55, %v262_v2  ;;  %v274_v32 = vand.u32 4294901760, %v2641_v7  ;;  %v2665_v34 = vsub.f32 %v94_v57, %v2634_v1  ;;  %v258_v36 = vand.u32 4294901760, %v257_v11 }
  0x13   :  { %331 = vmatpush.msra.mxu3 %v2564_v35  ;;  %375 = vmatpush.msrb.mxu0 %v2485_v5  ;;  %v269_v38 = vsub.f32 %v2623_v61, %v268_v17  ;;  %v280_v39 = vand.u32 4294901760, %v2653_v18  ;;  %v2675_v40 = vsub.f32 %v93_v63, %v2649_v12  ;;  %v2685_v47 = vsub.f32 %v92_v6, %v2657_v20  ;;  %v121_v6 = vld [vmem:[%s3942_s4 + $0xe8] sm:$0xff] }
  0x14   :  { %174 = vmatpush.msra.mxu1 %v2543_v28  ;;  %235 = vmatpush.msra.mxu2 %v234_v58  ;;  %v264_v41 = vand.u32 4294901760, %v263_v31  ;;  %v275_v44 = vsub.f32 %v2641_v7, %v274_v32  ;;  %v286_v46 = vand.u32 4294901760, %v2665_v34  ;;  %v2699_v57 = vand.u32 4294901760, %v123_v50  ;;  %v122_v58 = vld [vmem:[%s3942_s4 + $0xf0] sm:$0xff] }
  0x15   :  { %334 = vmatpush.msra.mxu3 %v2585_v45  ;;  %377 = vmatpush.msrb.mxu0 %v2496_v9  ;;  %v270_v51 = vand.u32 4294901760, %v269_v38  ;;  %v281_v52 = vsub.f32 %v2653_v18, %v280_v39  ;;  %v292_v56 = vand.u32 4294901760, %v2675_v40  ;;  %v298_v0 = vand.u32 4294901760, %v2685_v47 }
  0x16   :  { %176 = vmatpush.msra.mxu1 %v2578_v42  ;;  %241 = vmatpush.msra.mxu2 %v240_v62  ;;  %v276_v62 = vand.u32 4294901760, %v275_v44  ;;  %v287_v63 = vsub.f32 %v2665_v34, %v286_v46  ;;  %v2721_v31 = vand.u32 4294901760, %v122_v58  ;;  %v2732_v44 = vand.u32 4294901760, %v121_v6 }
  0x17   :  { %337 = vmatpush.msra.mxu3 %v2594_v49  ;;  %379 = vmatpush.msrb.mxu0 %v2498_v10  ;;  %v282_v11 = vand.u32 4294901760, %v281_v52  ;;  %vm64_vm0 = vcmask 392192   ;;  %vm1669_vm1 = vcmask 261120   ;;  %vm1724_vm2 = vcmask 1043456  }
  0x18   :  { %178 = vmatpush.msra.mxu1 %v2591_v48  ;;  %247 = vmatpush.msra.mxu2 %v246_v8  ;;  %v84_v8 = vld [vmem:[%s3939_s1] sm:$0xff]  ;;  %v288_v38 = vand.u32 4294901760, %v287_v63  ;;  %vm1693_vm3 = vcmask 64512   ;;  %vm1905_vm4 = vcmask 523264   ;;  %vm1907_vm5 = vcmask 785408  }
  0x19   :  { %340 = vmatpush.msra.mxu3 %v2608_v55  ;;  %381 = vmatpush.msrb.mxu0 %v2510_v14  ;;  %v2737_v52 = vand.u32 4294901760, %v84_v8  ;;  %v112_v55 = vld [vmem:[%s3942_s4 + $0xa0] sm:$0xff] }
  0x1a   :  { %180 = vmatpush.msra.mxu1 %v2604_v53  ;;  %253 = vmatpush.msra.mxu2 %v252_v29  ;;  %v293_v29 = vsub.f32 %v2675_v40, %v292_v56 }
  0x1b   :  { %343 = vmatpush.msra.mxu3 %v2623_v61  ;;  %383 = vmatpush.msrb.mxu0 %v2515_v16  ;;  %v2760_v15 = vsub.f32 %v84_v8, %v2737_v52 }
  0x1c   :  { %182 = vmatpush.msra.mxu1 %v2619_v59  ;;  %259 = vmatpush.msra.mxu2 %v258_v36  ;;  %v2726_v36 = vsub.f32 %v123_v50, %v2699_v57  ;;  %v294_v50 = vand.u32 4294901760, %v293_v29  ;;  %v2769_v29 = vand.u32 4294901760, %v119_v13 }
  0x1d   :  { %346 = vmatpush.msra.mxu3 %v2641_v7  ;;  %385 = vmatpush.msrb.mxu0 %v2536_v24  ;;  %v111_v7 = vld [vmem:[%s3942_s4 + $0x98] sm:$0xff] }
  0x1e   :  { %184 = vmatpush.msra.mxu1 %v2634_v1  ;;  %265 = vmatpush.msra.mxu2 %v264_v41  ;;  %v299_v41 = vsub.f32 %v2685_v47, %v298_v0  ;;  %v2806_v25 = vsub.f32 %v119_v13, %v2769_v29 }
  0x1f   :  { %349 = vmatpush.msra.mxu3 %v2653_v18  ;;  %387 = vmatpush.msrb.mxu0 %v2543_v28  ;;  %v110_v18 = vld [vmem:[%s3942_s4 + $0x90] sm:$0xff] }
  0x20   :  { %186 = vmatpush.msra.mxu1 %v2649_v12  ;;  %271 = vmatpush.msra.mxu2 %v270_v51  ;;  %v120_v51 = vld [vmem:[%s3942_s4 + $0xe0] sm:$0xff] }
  0x21   :  { %352 = vmatpush.msra.mxu3 %v2665_v34  ;;  %389 = vmatpush.msrb.mxu0 %v2578_v42  ;;  %v2749_v63 = vand.u32 4294901760, %v120_v51 }
  0x22   :  { %188 = vmatpush.msra.mxu1 %v2657_v20  ;;  %277 = vmatpush.msra.mxu2 %v276_v62  ;;  %v2744_v62 = vsub.f32 %v122_v58, %v2721_v31  ;;  %v2757_v58 = vsub.f32 %v121_v6, %v2732_v44 }
  0x23   :  { %355 = vmatpush.msra.mxu3 %v2675_v40  ;;  %391 = vmatpush.msrb.mxu0 %v2591_v48  ;;  %v2782_v8 = vsub.f32 %v120_v51, %v2749_v63  ;;  %v88_v51 = vld [vmem:[%s3939_s1 + $0x20] sm:$0xff] }
  0x24   :  { %418 = vmatpush.msrb.mxu1 %v208_v22  ;;  %283 = vmatpush.msra.mxu2 %v282_v11  ;;  %v3946_v22 = vand.u32 4294901760, %v2726_v36  ;;  %v300_v11 = vand.u32 4294901760, %v299_v41  ;;  %v3948_v6 = vand.u32 4294901760, %v2744_v62  ;;  %v3949_v41 = vand.u32 4294901760, %v2760_v15 }
  0x25   :  { %358 = vmatpush.msra.mxu3 %v2685_v47  ;;  %393 = vmatpush.msrb.mxu0 %v2604_v53 }
  0x26   :  { %422 = vmatpush.msrb.mxu1 %v214_v23  ;;  %289 = vmatpush.msra.mxu2 %v288_v38  ;;  %v118_v23 = vld [vmem:[%s3942_s4 + $0xd0] sm:$0xff]  ;;  %v581_v19 = vsub.f32 %v2726_v36, %v3946_v22  ;;  %v3947_v38 = vand.u32 4294901760, %v2757_v58  ;;  %v598_v22 = vand.u32 4294901760, %v2782_v8  ;;  %v192_v30 = vsub.f32 %v2760_v15, %v3949_v41 }
  0x27   :  { %530 = vmatpush.msrb.mxu3 %v2699_v57  ;;  %395 = vmatpush.msrb.mxu0 %v2619_v59 }
  0x28   :  { %426 = vmatpush.msrb.mxu1 %v220_v26  ;;  %295 = vmatpush.msra.mxu2 %v294_v50  ;;  %v117_v26 = vld [vmem:[%s3942_s4 + $0xc8] sm:$0xff]  ;;  %v587_v50 = vsub.f32 %v2744_v62, %v3948_v6  ;;  %v593_v13 = vsub.f32 %v2757_v58, %v3947_v38  ;;  %v604_v6 = vand.u32 4294901760, %v2806_v25 }
  0x29   :  { %532 = vmatpush.msrb.mxu3 %v2721_v31  ;;  %397 = vmatpush.msrb.mxu0 %v2634_v1 }
  0x2a   :  { %430 = vmatpush.msrb.mxu1 %v226_v27  ;;  %301 = vmatpush.msra.mxu2 %v300_v11  ;;  %v2788_v27 = vand.u32 4294901760, %v118_v23  ;;  %v2803_v11 = vand.u32 4294901760, %v117_v26 }
  0x2b   :  { %534 = vmatpush.msrb.mxu3 %v2732_v44  ;;  %399 = vmatpush.msrb.mxu0 %v2649_v12 }
  0x2c   :  { %434 = vmatpush.msrb.mxu1 %v232_v33  ;;  %489 = vmatpush.msrb.mxu2 %v2481_v3  ;;  %v582_v3 = vand.u32 4294901760, %v581_v19  ;;  %v116_v33 = vld [vmem:[%s3942_s4 + $0xc0] sm:$0xff]  ;;  %v2828_v19 = vand.u32 4294901760, %v88_v51  ;;  %v2839_v41 = vsub.f32 %v117_v26, %v2803_v11  ;;  %v114_v26 = vld [vmem:[%s3942_s4 + $0xb0] sm:$0xff] }
  0x2d   :  { %536 = vmatpush.msrb.mxu3 %v2749_v63  ;;  %2249 = vmatmul.msk.bf16.vlgmr.msra.gmra.mxu0 %vm64_vm0, %v2307_v21  ;;  %v588_v21 = vand.u32 4294901760, %v587_v50  ;;  %v2835_v38 = vand.u32 4294901760, %v116_v33  ;;  %v113_v50 = vld [vmem:[%s3942_s4 + $0xa8] sm:$0xff] }
  0x2e   :  { %438 = vmatpush.msrb.mxu1 %v238_v37  ;;  %491 = vmatpush.msrb.mxu2 %v2483_v4  ;;  %v115_v4 = vld [vmem:[%s3942_s4 + $0xb8] sm:$0xff]  ;;  %v2826_v37 = vsub.f32 %v118_v23, %v2788_v27  ;;  %v193_v23 = vand.u32 4294901760, %v192_v30 }
  0x2f   :  { %401 = vmatpush.msrb.mxu0 %v2657_v20  ;;  %538 = vmatpush.msrb.mxu3 %v2769_v29  ;;  %v2847_v35 = vand.u32 4294901760, %v115_v4 }
  0x30   :  { %442 = vmatpush.msrb.mxu1 %v244_v43  ;;  %493 = vmatpush.msrb.mxu2 %v2485_v5  ;;  %v599_v5 = vsub.f32 %v2782_v8, %v598_v22  ;;  %v594_v43 = vand.u32 4294901760, %v593_v13  ;;  %v610_v45 = vand.u32 4294901760, %v2826_v37 }
  0x31   :  { %583 = vmatpush.msra.mxu0 %v582_v3  ;;  %540 = vmatpush.msrb.mxu3 %v2788_v27  ;;  %v616_v3 = vand.u32 4294901760, %v2839_v41  ;;  %v2881_v30 = vsub.f32 %v115_v4, %v2847_v35 }
  0x32   :  { %446 = vmatpush.msrb.mxu1 %v250_v54  ;;  %495 = vmatpush.msrb.mxu2 %v2496_v9  ;;  %v2855_v54 = vsub.f32 %v88_v51, %v2828_v19  ;;  %v605_v9 = vsub.f32 %v2806_v25, %v604_v6  ;;  %v2869_v51 = vsub.f32 %v116_v33, %v2835_v38  ;;  %v600_v49 = vand.u32 4294901760, %v599_v5 }
  0x33   :  { %589 = vmatpush.msra.mxu0 %v588_v21  ;;  %542 = vmatpush.msrb.mxu3 %v2803_v11  ;;  %v617_v33 = vsub.f32 %v2839_v41, %v616_v3  ;;  %v2910_v5 = vand.u32 4294901760, %v112_v55 }
  0x34   :  { %450 = vmatpush.msrb.mxu1 %v256_v60  ;;  %497 = vmatpush.msrb.mxu2 %v2498_v10  ;;  %v2874_v10 = vand.u32 4294901760, %v114_v26  ;;  %v611_v60 = vsub.f32 %v2826_v37, %v610_v45  ;;  %v199_v13 = vand.u32 4294901760, %v2855_v54  ;;  %v622_v61 = vand.u32 4294901760, %v2869_v51 }
  0x35   :  { %595 = vmatpush.msra.mxu0 %v594_v43  ;;  %194 = vmatmul.f32.vlgmr.msra.gmra.mxu1 %v193_v23  ;;  %v618_v23 = vand.u32 4294901760, %v617_v33  ;;  %v2945_v34 = vsub.f32 %v112_v55, %v2910_v5  ;;  %v108_v55 = vld [vmem:[%s3942_s4 + $0x80] sm:$0xff] }
  0x36   :  { %454 = vmatpush.msrb.mxu1 %v262_v2  ;;  %499 = vmatpush.msrb.mxu2 %v2510_v14  ;;  %v2886_v14 = vand.u32 4294901760, %v113_v50  ;;  %v606_v2 = vand.u32 4294901760, %v605_v9  ;;  %v612_v4 = vand.u32 4294901760, %v611_v60  ;;  %v200_v21 = vsub.f32 %v2855_v54, %v199_v13 }
  0x37   :  { %303 = vmatmul.f32.vlgmr.msra.gmra.mxu2 %v2737_v52  ;;  %544 = vmatpush.msrb.mxu3 %v2835_v38  ;;  %v2978_v47 = vand.u32 4294901760, %v108_v55 }
  0x38   :  { %458 = vmatpush.msrb.mxu1 %v268_v17  ;;  %501 = vmatpush.msrb.mxu2 %v2515_v16  ;;  %v85_v16 = vld [vmem:[%s3939_s1 + $0x8] sm:$0xff]  ;;  %v2904_v17 = vsub.f32 %v114_v26, %v2874_v10  ;;  %v623_v26 = vsub.f32 %v2869_v51, %v622_v61  ;;  %v201_v9 = vand.u32 4294901760, %v200_v21  ;;  %v3954_v21 = vand.u32 4294901760, %v2760_v15 }
  0x39   :  { %601 = vmatpush.msra.mxu0 %v600_v49  ;;  %361 = vmatmul.f32.vlgmr.msra.gmra.mxu3 %v2760_v15  ;;  %v2922_v43 = vand.u32 4294901760, %v85_v16  ;;  %v109_v49 = vld [vmem:[%s3942_s4 + $0x88] sm:$0xff] }
  0x3a   :  { %462 = vmatpush.msrb.mxu1 %v274_v32  ;;  %503 = vmatpush.msrb.mxu2 %v2536_v24  ;;  %v628_v32 = vand.u32 4294901760, %v2881_v30  ;;  %v2920_v24 = vsub.f32 %v113_v50, %v2886_v14  ;;  %v2966_v40 = vand.u32 4294901760, %v109_v49 }
  0x3b   :  { %546 = vmatpush.msrb.mxu3 %v2847_v35  ;;  %607 = vmatpush.msra.mxu0 %v606_v2  ;;  %v2954_v60 = vsub.f32 %v85_v16, %v2922_v43  ;;  %v624_v2 = vand.u32 4294901760, %v623_v26  ;;  %v646_v16 = vand.u32 4294901760, %v2945_v34 }
  0x3c   :  { %466 = vmatpush.msrb.mxu1 %v280_v39  ;;  %505 = vmatpush.msrb.mxu2 %v2543_v28  ;;  %v2934_v28 = vand.u32 4294901760, %v111_v7  ;;  %v634_v39 = vand.u32 4294901760, %v2904_v17  ;;  %v629_v50 = vsub.f32 %v2881_v30, %v628_v32 }
  0x3d   :  { %548 = vmatpush.msrb.mxu3 %v2874_v10  ;;  %613 = vmatpush.msra.mxu0 %v612_v4  ;;  %v647_v26 = vsub.f32 %v2945_v34, %v646_v16 }
  0x3e   :  { %470 = vmatpush.msrb.mxu1 %v286_v46  ;;  %507 = vmatpush.msrb.mxu2 %v2578_v42  ;;  %v2950_v42 = vand.u32 4294901760, %v110_v18  ;;  %v640_v46 = vand.u32 4294901760, %v2920_v24  ;;  %v630_v33 = vand.u32 4294901760, %v629_v50  ;;  %v3003_v50 = vsub.f32 %v108_v55, %v2978_v47 }
  0x3f   :  { %550 = vmatpush.msrb.mxu3 %v2886_v14  ;;  %619 = vmatpush.msra.mxu0 %v618_v23  ;;  %v2990_v23 = vsub.f32 %v109_v49, %v2966_v40 }
  0x40   :  { %474 = vmatpush.msrb.mxu1 %v292_v56  ;;  %509 = vmatpush.msrb.mxu2 %v2591_v48  ;;  %v635_v48 = vsub.f32 %v2904_v17, %v634_v39  ;;  %v2969_v56 = vsub.f32 %v111_v7, %v2934_v28  ;;  %v2982_v4 = vsub.f32 %v110_v18, %v2950_v42 }
  0x41   :  { %202 = vmatmul.f32.gmra.mxu1 %v201_v9  ;;  %307 = vmatmul.f32.gmra.mxu2 %v2828_v19  ;;  %v664_v49 = vand.u32 4294901760, %v2990_v23 }
  0x42   :  { %478 = vmatpush.msrb.mxu1 %v298_v0  ;;  %511 = vmatpush.msrb.mxu2 %v2604_v53  ;;  %v641_v53 = vsub.f32 %v2920_v24, %v640_v46  ;;  %v563_v0 = vand.u32 4294901760, %v2954_v60  ;;  %v652_v7 = vand.u32 4294901760, %v2969_v56  ;;  %v658_v9 = vand.u32 4294901760, %v2982_v4 }
  0x43   :  { %552 = vmatpush.msrb.mxu3 %v2910_v5  ;;  %625 = vmatpush.msra.mxu0 %v624_v2  ;;  %v648_v2 = vand.u32 4294901760, %v647_v26 }
  0x44   :  { %685 = vmatpush.msra.mxu1 %v2726_v36  ;;  %513 = vmatpush.msrb.mxu2 %v2619_v59  ;;  %v636_v59 = vand.u32 4294901760, %v635_v48  ;;  %v642_v18 = vand.u32 4294901760, %v641_v53  ;;  %v564_v15 = vsub.f32 %v2954_v60, %v563_v0  ;;  %v670_v48 = vand.u32 4294901760, %v3003_v50  ;;  %v89_v53 = vld [vmem:[%s3939_s1 + $0x28] sm:$0xff] }
  0x45   :  { %366 = vmatmul.f32.gmra.mxu3 %v2855_v54  ;;  %405 = vmatmul.f32.vlgmr.msrb.gmra.mxu0 %v3954_v21  ;;  %v3956_v54 = vand.u32 4294901760, %v2744_v62 }
  0x46   :  { %688 = vmatpush.msra.mxu1 %v2744_v62  ;;  %515 = vmatpush.msrb.mxu2 %v2634_v1  ;;  %v653_v1 = vsub.f32 %v2969_v56, %v652_v7  ;;  %v565_v55 = vand.u32 4294901760, %v564_v15  ;;  %v671_v21 = vsub.f32 %v3003_v50, %v670_v48 }
  0x47   :  { %554 = vmatpush.msrb.mxu3 %v2934_v28  ;;  %631 = vmatpush.msra.mxu0 %v630_v33  ;;  %v665_v33 = vsub.f32 %v2990_v23, %v664_v49 }
  0x48   :  { %691 = vmatpush.msra.mxu1 %v2757_v58  ;;  %517 = vmatpush.msrb.mxu2 %v2649_v12  ;;  %v659_v12 = vsub.f32 %v2982_v4, %v658_v9 }
  0x49   :  { %556 = vmatpush.msrb.mxu3 %v2950_v42  ;;  %637 = vmatpush.msra.mxu0 %v636_v59  ;;  %v3955_v59 = vand.u32 4294901760, %v2726_v36  ;;  %v666_v26 = vand.u32 4294901760, %v665_v33  ;;  %v3957_v36 = vand.u32 4294901760, %v2757_v58 }
  0x4a   :  { %694 = vmatpush.msra.mxu1 %v2782_v8  ;;  %519 = vmatpush.msrb.mxu2 %v2657_v20  ;;  %v654_v20 = vand.u32 4294901760, %v653_v1 }
  0x4b   :  { %558 = vmatpush.msrb.mxu3 %v2966_v40  ;;  %643 = vmatpush.msra.mxu0 %v642_v18  ;;  %v3039_v18 = vand.u32 4294901760, %v89_v53 }
  0x4c   :  { %480 = vmatmul.f32.vlgmr.msrb.gmra.mxu1 %v2737_v52  ;;  %521 = vmatmul.f32.vlgmr.msrb.gmra.mxu2 %v2737_v52  ;;  %v660_v52 = vand.u32 4294901760, %v659_v12 }
  0x4d   :  { %697 = vmatpush.msra.mxu1 %v2806_v25  ;;  %743 = vmatpush.msra.mxu2 %v2699_v57  ;;  %v3050_v15 = vsub.f32 %v89_v53, %v3039_v18 }
  0x4e   :  { %560 = vmatpush.msrb.mxu3 %v2978_v47  ;;  %649 = vmatpush.msra.mxu0 %v648_v2  ;;  %v130_v2 = vld [vmem:[%s3942_s4 + $0x130] sm:$0xff] }
  0x4f   :  { %411 = vmatmul.f32.gmra.mxu0 %v199_v13  ;;  %566 = vmatmul.f32.vlgmr.msrb.gmra.mxu3 %v565_v55  ;;  %v672_v13 = vand.u32 4294901760, %v671_v21  ;;  %v571_v62 = vand.u32 4294901760, %v3050_v15  ;;  %v3223_v33 = vand.u32 4294901760, %v130_v2  ;;  %v86_v21 = vld [vmem:[%s3939_s1 + $0x10] sm:$0xff] }
  0x50   :  { %700 = vmatpush.msra.mxu1 %v2826_v37  ;;  %745 = vmatpush.msra.mxu2 %v2721_v31 }
  0x51   :  { %790 = vmatpush.msra.mxu3 %v3955_v59  ;;  %655 = vmatpush.msra.mxu0 %v654_v20 }
  0x52   :  { %703 = vmatpush.msra.mxu1 %v2839_v41  ;;  %747 = vmatpush.msra.mxu2 %v2732_v44 }
  0x53   :  { %794 = vmatpush.msra.mxu3 %v3956_v54  ;;  %661 = vmatpush.msra.mxu0 %v660_v52  ;;  %v127_v54 = vld [vmem:[%s3942_s4 + $0x118] sm:$0xff] }
  0x54   :  { %706 = vmatpush.msra.mxu1 %v2869_v51  ;;  %749 = vmatpush.msra.mxu2 %v2749_v63 }
  0x55   :  { %798 = vmatpush.msra.mxu3 %v3957_v36  ;;  %667 = vmatpush.msra.mxu0 %v666_v26 }
  0x56   :  { %709 = vmatpush.msra.mxu1 %v2881_v30  ;;  %751 = vmatpush.msra.mxu2 %v2769_v29  ;;  %v133_v30 = vld [vmem:[%s3942_s4 + $0x148] sm:$0xff] }
  0x57   :  { %802 = vmatpush.msra.mxu3 %v598_v22  ;;  %673 = vmatpush.msra.mxu0 %v672_v13  ;;  %v139_v22 = vld [vmem:[%s3942_s4 + $0x178] sm:$0xff] }
  0x58   :  { %675 = vmatmul.f32.vlgmr.msra.gmra.mxu0 %v2922_v43  ;;  %712 = vmatpush.msra.mxu1 %v2904_v17  ;;  %v3080_v58 = vand.u32 4294901760, %v139_v22 }
  0x59   :  { %753 = vmatpush.msra.mxu2 %v2788_v27  ;;  %806 = vmatpush.msra.mxu3 %v604_v6 }
  0x5a   :  { %861 = vmatpush.msrb.mxu0 %v2699_v57  ;;  %715 = vmatpush.msra.mxu1 %v2920_v24  ;;  %v572_v57 = vsub.f32 %v3050_v15, %v571_v62  ;;  %v3101_v41 = vsub.f32 %v139_v22, %v3080_v58 }
  0x5b   :  { %755 = vmatpush.msra.mxu2 %v2803_v11  ;;  %810 = vmatpush.msra.mxu3 %v610_v45 }
  0x5c   :  { %863 = vmatpush.msrb.mxu0 %v2721_v31  ;;  %718 = vmatpush.msra.mxu1 %v2945_v34  ;;  %v138_v31 = vld [vmem:[%s3942_s4 + $0x170] sm:$0xff]  ;;  %v573_v6 = vand.u32 4294901760, %v572_v57  ;;  %v952_v45 = vand.u32 4294901760, %v3101_v41  ;;  %v3167_v34 = vand.u32 4294901760, %v133_v30 }
  0x5d   :  { %757 = vmatpush.msra.mxu2 %v2835_v38  ;;  %814 = vmatpush.msra.mxu3 %v616_v3  ;;  %v3095_v8 = vand.u32 4294901760, %v138_v31 }
  0x5e   :  { %865 = vmatpush.msrb.mxu0 %v2732_v44  ;;  %484 = vmatmul.f32.gmra.mxu1 %v2828_v19  ;;  %v137_v44 = vld [vmem:[%s3942_s4 + $0x168] sm:$0xff]  ;;  %v953_v17 = vsub.f32 %v3101_v41, %v952_v45  ;;  %v3201_v55 = vsub.f32 %v133_v30, %v3167_v34 }
  0x5f   :  { %721 = vmatpush.msra.mxu1 %v2969_v56  ;;  %759 = vmatpush.msra.mxu2 %v2847_v35  ;;  %v3108_v25 = vand.u32 4294901760, %v137_v44 }
  0x60   :  { %818 = vmatpush.msra.mxu3 %v622_v61  ;;  %867 = vmatpush.msrb.mxu0 %v2749_v63  ;;  %v136_v63 = vld [vmem:[%s3942_s4 + $0x160] sm:$0xff]  ;;  %v988_v53 = vand.u32 4294901760, %v3201_v55 }
  0x61   :  { %724 = vmatpush.msra.mxu1 %v2982_v4  ;;  %761 = vmatpush.msra.mxu2 %v2874_v10  ;;  %v3117_v37 = vand.u32 4294901760, %v136_v63  ;;  %v3134_v51 = vsub.f32 %v137_v44, %v3108_v25  ;;  %v3264_v44 = vand.u32 4294901760, %v86_v21 }
  0x62   :  { %822 = vmatpush.msra.mxu3 %v628_v32  ;;  %869 = vmatpush.msrb.mxu0 %v2769_v29  ;;  %v135_v29 = vld [vmem:[%s3942_s4 + $0x158] sm:$0xff]  ;;  %v989_v22 = vsub.f32 %v3201_v55, %v988_v53 }
  0x63   :  { %525 = vmatmul.f32.gmra.mxu2 %v2828_v19  ;;  %727 = vmatpush.msra.mxu1 %v2990_v23  ;;  %v3120_v19 = vsub.f32 %v138_v31, %v3095_v8  ;;  %v3128_v3 = vand.u32 4294901760, %v135_v29  ;;  %v3146_v61 = vsub.f32 %v136_v63, %v3117_v37  ;;  %v964_v24 = vand.u32 4294901760, %v3134_v51  ;;  %v126_v31 = vld [vmem:[%s3942_s4 + $0x110] sm:$0xff] }
  0x64   :  { %763 = vmatpush.msra.mxu2 %v2886_v14  ;;  %826 = vmatpush.msra.mxu3 %v634_v39  ;;  %v132_v39 = vld [vmem:[%s3942_s4 + $0x140] sm:$0xff]  ;;  %v3282_v30 = vand.u32 4294901760, %v126_v31 }
  0x65   :  { %871 = vmatpush.msrb.mxu0 %v2788_v27  ;;  %574 = vmatmul.f32.gmra.mxu3 %v573_v6  ;;  %v134_v27 = vld [vmem:[%s3942_s4 + $0x150] sm:$0xff]  ;;  %v970_v56 = vand.u32 4294901760, %v3146_v61  ;;  %v3267_v6 = vand.u32 4294901760, %v127_v54 }
  0x66   :  { %730 = vmatpush.msra.mxu1 %v3003_v50  ;;  %765 = vmatpush.msra.mxu2 %v2910_v5  ;;  %v3153_v32 = vand.u32 4294901760, %v134_v27  ;;  %v128_v50 = vld [vmem:[%s3942_s4 + $0x120] sm:$0xff] }
  0x67   :  { %830 = vmatpush.msra.mxu3 %v640_v46  ;;  %873 = vmatpush.msrb.mxu0 %v2803_v11  ;;  %v958_v11 = vand.u32 4294901760, %v3120_v19  ;;  %v971_v23 = vsub.f32 %v3146_v61, %v970_v56  ;;  %v3250_v36 = vand.u32 4294901760, %v128_v50 }
  0x68   :  { %733 = vmatmul.f32.vlgmr.msra.gmra.mxu1 %v2954_v60  ;;  %767 = vmatpush.msra.mxu2 %v2934_v28  ;;  %v3184_v4 = vsub.f32 %v134_v27, %v3153_v32  ;;  %v125_v27 = vld [vmem:[%s3942_s4 + $0x108] sm:$0xff] }
  0x69   :  { %902 = vmatpush.msrb.mxu1 %v3080_v58  ;;  %834 = vmatpush.msra.mxu3 %v646_v16  ;;  %v959_v46 = vsub.f32 %v3120_v19, %v958_v11  ;;  %v131_v16 = vld [vmem:[%s3942_s4 + $0x138] sm:$0xff] }
  0x6a   :  { %875 = vmatpush.msrb.mxu0 %v2835_v38  ;;  %769 = vmatpush.msra.mxu2 %v2950_v42  ;;  %v3163_v38 = vsub.f32 %v135_v29, %v3128_v3 }
  0x6b   :  { %904 = vmatpush.msrb.mxu1 %v3095_v8  ;;  %838 = vmatpush.msra.mxu3 %v652_v7  ;;  %v3181_v7 = vand.u32 4294901760, %v132_v39  ;;  %v960_v12 = vand.u32 4294901760, %v959_v46  ;;  %v3297_v46 = vsub.f32 %v86_v21, %v3264_v44 }
  0x6c   :  { %877 = vmatpush.msrb.mxu0 %v2847_v35  ;;  %771 = vmatpush.msra.mxu2 %v2966_v40  ;;  %v954_v35 = vand.u32 4294901760, %v953_v17  ;;  %v976_v1 = vand.u32 4294901760, %v3163_v38 }
  0x6d   :  { %906 = vmatpush.msrb.mxu1 %v3108_v25  ;;  %842 = vmatpush.msra.mxu3 %v658_v9  ;;  %v965_v9 = vsub.f32 %v3134_v51, %v964_v24  ;;  %v3215_v20 = vsub.f32 %v132_v39, %v3181_v7  ;;  %v124_v39 = vld [vmem:[%s3942_s4 + $0x100] sm:$0xff] }
  0x6e   :  { %879 = vmatpush.msrb.mxu0 %v2874_v10  ;;  %773 = vmatpush.msra.mxu2 %v2978_v47  ;;  %v3195_v10 = vand.u32 4294901760, %v131_v16 }
  0x6f   :  { %679 = vmatmul.f32.gmra.mxu0 %v3039_v18  ;;  %908 = vmatpush.msrb.mxu1 %v3117_v37  ;;  %v966_v60 = vand.u32 4294901760, %v965_v9  ;;  %v994_v26 = vand.u32 4294901760, %v3215_v20 }
  0x70   :  { %846 = vmatpush.msra.mxu3 %v664_v49  ;;  %881 = vmatpush.msrb.mxu0 %v2886_v14  ;;  %v982_v14 = vand.u32 4294901760, %v3184_v4  ;;  %v129_v49 = vld [vmem:[%s3942_s4 + $0x128] sm:$0xff] }
  0x71   :  { %738 = vmatmul.f32.gmra.mxu1 %v3050_v15  ;;  %777 = vmatmul.f32.vlgmr.msra.gmra.mxu2 %v563_v0  ;;  %v977_v0 = vsub.f32 %v3163_v38, %v976_v1  ;;  %v3235_v52 = vand.u32 4294901760, %v129_v49  ;;  %v995_v29 = vsub.f32 %v3215_v20, %v994_v26  ;;  %v990_v15 = vand.u32 4294901760, %v989_v22 }
  0x72   :  { %910 = vmatpush.msrb.mxu1 %v3128_v3  ;;  %955 = vmatpush.msrb.mxu2 %v954_v35  ;;  %v983_v59 = vsub.f32 %v3184_v4, %v982_v14  ;;  %v3305_v35 = vsub.f32 %v127_v54, %v3267_v6 }
  0x73   :  { %850 = vmatpush.msra.mxu3 %v670_v48  ;;  %883 = vmatpush.msrb.mxu0 %v2910_v5  ;;  %v3232_v48 = vsub.f32 %v131_v16, %v3195_v10  ;;  %v972_v5 = vand.u32 4294901760, %v971_v23  ;;  %v978_v13 = vand.u32 4294901760, %v977_v0  ;;  %v3301_v16 = vand.u32 4294901760, %v125_v27 }
  0x74   :  { %852 = vmatmul.f32.vlgmr.msra.gmra.mxu3 %v2922_v43  ;;  %912 = vmatpush.msrb.mxu1 %v3153_v32  ;;  %v984_v63 = vand.u32 4294901760, %v983_v59  ;;  %v996_v9 = vand.u32 4294901760, %v995_v29  ;;  %v935_v0 = vand.u32 4294901760, %v3297_v46 }
  0x75   :  { %961 = vmatpush.msrb.mxu2 %v960_v12  ;;  %1057 = vmatpush.msrb.mxu3 %v3101_v41  ;;  %v1000_v57 = vand.u32 4294901760, %v3232_v48  ;;  %v3316_v12 = vand.u32 4294901760, %v124_v39  ;;  %v3331_v21 = vsub.f32 %v125_v27, %v3301_v16 }
  0x76   :  { %885 = vmatpush.msrb.mxu0 %v2934_v28  ;;  %914 = vmatpush.msrb.mxu1 %v3167_v34  ;;  %v3253_v28 = vsub.f32 %v130_v2, %v3223_v33  ;;  %v90_v2 = vld [vmem:[%s3939_s1 + $0x30] sm:$0xff] }
  0x77   :  { %967 = vmatpush.msrb.mxu2 %v966_v60  ;;  %1060 = vmatpush.msrb.mxu3 %v3120_v19  ;;  %v3333_v59 = vand.u32 4294901760, %v90_v2  ;;  %v152_v19 = vld [vmem:[%s3942_s4 + $0x1e0] sm:$0xff] }
  0x78   :  { %887 = vmatpush.msrb.mxu0 %v2950_v42  ;;  %916 = vmatpush.msrb.mxu1 %v3181_v7  ;;  %v3270_v42 = vsub.f32 %v129_v49, %v3235_v52  ;;  %v1006_v17 = vand.u32 4294901760, %v3253_v28  ;;  %v3320_v49 = vsub.f32 %v126_v31, %v3282_v30  ;;  %v3343_v31 = vsub.f32 %v124_v39, %v3316_v12 }
  0x79   :  { %973 = vmatpush.msrb.mxu2 %v972_v5  ;;  %1063 = vmatpush.msrb.mxu3 %v3134_v51  ;;  %v1024_v5 = vand.u32 4294901760, %v3305_v35 }
  0x7a   :  { %889 = vmatpush.msrb.mxu0 %v2966_v40  ;;  %783 = vmatmul.f32.gmra.mxu2 %v571_v62  ;;  %v3286_v40 = vsub.f32 %v128_v50, %v3250_v36  ;;  %v1001_v62 = vsub.f32 %v3232_v48, %v1000_v57  ;;  %v1030_v22 = vand.u32 4294901760, %v3320_v49 }
  0x7b   :  { %918 = vmatpush.msrb.mxu1 %v3195_v10  ;;  %979 = vmatpush.msrb.mxu2 %v978_v13  ;;  %v1025_v27 = vsub.f32 %v3305_v35, %v1024_v5 }
  0x7c   :  { %1066 = vmatpush.msrb.mxu3 %v3146_v61  ;;  %891 = vmatpush.msrb.mxu0 %v2978_v47  ;;  %v1012_v47 = vand.u32 4294901760, %v3270_v42  ;;  %v1018_v23 = vand.u32 4294901760, %v3286_v40  ;;  %v1002_v60 = vand.u32 4294901760, %v1001_v62  ;;  %v3356_v62 = vsub.f32 %v90_v2, %v3333_v59  ;;  %v151_v61 = vld [vmem:[%s3942_s4 + $0x1d8] sm:$0xff] }
  0x7d   :  { %856 = vmatmul.f32.gmra.mxu3 %v3039_v18  ;;  %893 = vmatmul.f32.vlgmr.msrb.gmra.mxu0 %v2922_v43  ;;  %v1007_v43 = vsub.f32 %v3253_v28, %v1006_v17 }
  0x7e   :  { %920 = vmatpush.msrb.mxu1 %v3223_v33  ;;  %985 = vmatpush.msrb.mxu2 %v984_v63  ;;  %v1013_v50 = vsub.f32 %v3270_v42, %v1012_v47  ;;  %v1019_v13 = vsub.f32 %v3286_v40, %v1018_v23  ;;  %v936_v63 = vsub.f32 %v3297_v46, %v935_v0 }
  0x7f   :  { %1069 = vmatpush.msrb.mxu3 %v3163_v38  ;;  %1115 = vmatpush.msra.mxu0 %v3080_v58  ;;  %v1008_v54 = vand.u32 4294901760, %v1007_v43  ;;  %v1042_v43 = vand.u32 4294901760, %v3343_v31  ;;  %v3443_v38 = vand.u32 4294901760, %v151_v61 }
  0x80   :  { %922 = vmatpush.msrb.mxu1 %v3235_v52  ;;  %991 = vmatpush.msrb.mxu2 %v990_v15  ;;  %v1014_v29 = vand.u32 4294901760, %v1013_v50  ;;  %v1036_v15 = vand.u32 4294901760, %v3331_v21  ;;  %v1020_v39 = vand.u32 4294901760, %v1019_v13  ;;  %v937_v2 = vand.u32 4294901760, %v936_v63  ;;  %v155_v63 = vld [vmem:[%s3942_s4 + $0x1f8] sm:$0xff] }
  0x81   :  { %1072 = vmatpush.msrb.mxu3 %v3184_v4  ;;  %1117 = vmatpush.msra.mxu0 %v3095_v8  ;;  %v943_v50 = vand.u32 4294901760, %v3356_v62  ;;  %v1043_v13 = vsub.f32 %v3343_v31, %v1042_v43 }
  0x82   :  { %924 = vmatpush.msrb.mxu1 %v3250_v36  ;;  %997 = vmatpush.msrb.mxu2 %v996_v9  ;;  %v1031_v9 = vsub.f32 %v3320_v49, %v1030_v22 }
  0x83   :  { %1075 = vmatpush.msrb.mxu3 %v3201_v55  ;;  %1119 = vmatpush.msra.mxu0 %v3108_v25  ;;  %v1044_v41 = vand.u32 4294901760, %v1043_v13 }
  0x84   :  { %926 = vmatpush.msrb.mxu1 %v3267_v6  ;;  %1003 = vmatpush.msrb.mxu2 %v1002_v60  ;;  %v1037_v60 = vsub.f32 %v3331_v21, %v1036_v15 }
  0x85   :  { %1078 = vmatpush.msrb.mxu3 %v3215_v20  ;;  %1121 = vmatpush.msra.mxu0 %v3117_v37 }
  0x86   :  { %897 = vmatmul.f32.gmra.mxu0 %v3039_v18  ;;  %928 = vmatpush.msrb.mxu1 %v3282_v30  ;;  %v1026_v18 = vand.u32 4294901760, %v1025_v27  ;;  %v944_v27 = vsub.f32 %v3356_v62, %v943_v50 }
  0x87   :  { %1009 = vmatpush.msrb.mxu2 %v1008_v54  ;;  %1081 = vmatpush.msrb.mxu3 %v3232_v48  ;;  %v1032_v54 = vand.u32 4294901760, %v1031_v9  ;;  %v153_v9 = vld [vmem:[%s3942_s4 + $0x1e8] sm:$0xff] }
  0x88   :  { %1123 = vmatpush.msra.mxu0 %v3128_v3  ;;  %930 = vmatpush.msrb.mxu1 %v3301_v16  ;;  %v3415_v51 = vand.u32 4294901760, %v153_v9 }
  0x89   :  { %1015 = vmatpush.msrb.mxu2 %v1014_v29  ;;  %1084 = vmatpush.msrb.mxu3 %v3253_v28  ;;  %v1038_v29 = vand.u32 4294901760, %v1037_v60 }
  0x8a   :  { %1125 = vmatpush.msra.mxu0 %v3153_v32  ;;  %932 = vmatpush.msrb.mxu1 %v3316_v12  ;;  %v3438_v13 = vsub.f32 %v153_v9, %v3415_v51 }
  0x8b   :  { %1021 = vmatpush.msrb.mxu2 %v1020_v39  ;;  %1087 = vmatpush.msrb.mxu3 %v3270_v42  ;;  %v154_v39 = vld [vmem:[%s3942_s4 + $0x1f0] sm:$0xff] }
  0x8c   :  { %1127 = vmatpush.msra.mxu0 %v3167_v34  ;;  %938 = vmatmul.f32.vlgmr.msrb.gmra.mxu1 %v937_v2  ;;  %v945_v2 = vand.u32 4294901760, %v944_v27 }
  0x8d   :  { %1162 = vmatpush.msra.mxu1 %v952_v45  ;;  %1027 = vmatpush.msrb.mxu2 %v1026_v18  ;;  %v3394_v45 = vand.u32 4294901760, %v155_v63  ;;  %v3403_v18 = vand.u32 4294901760, %v154_v39 }
  0x8e   :  { %1090 = vmatpush.msrb.mxu3 %v3286_v40  ;;  %1129 = vmatpush.msra.mxu0 %v3181_v7  ;;  %v143_v40 = vld [vmem:[%s3942_s4 + $0x198] sm:$0xff] }
  0x8f   :  { %1166 = vmatpush.msra.mxu1 %v958_v11  ;;  %1033 = vmatpush.msrb.mxu2 %v1032_v54  ;;  %v3413_v11 = vsub.f32 %v155_v63, %v3394_v45  ;;  %v150_v54 = vld [vmem:[%s3942_s4 + $0x1d0] sm:$0xff] }
  0x90   :  { %1093 = vmatpush.msrb.mxu3 %v3305_v35  ;;  %1131 = vmatpush.msra.mxu0 %v3195_v10  ;;  %v3457_v4 = vand.u32 4294901760, %v150_v54  ;;  %v142_v35 = vld [vmem:[%s3942_s4 + $0x190] sm:$0xff] }
  0x91   :  { %1170 = vmatpush.msra.mxu1 %v964_v24  ;;  %1039 = vmatpush.msrb.mxu2 %v1038_v29  ;;  %v3420_v24 = vand.u32 4294901760, %v152_v19  ;;  %v1324_v60 = vand.u32 4294901760, %v3413_v11  ;;  %v148_v29 = vld [vmem:[%s3942_s4 + $0x1c0] sm:$0xff] }
  0x92   :  { %1096 = vmatpush.msrb.mxu3 %v3320_v49  ;;  %1133 = vmatpush.msra.mxu0 %v3223_v33  ;;  %v141_v49 = vld [vmem:[%s3942_s4 + $0x188] sm:$0xff] }
  0x93   :  { %1174 = vmatpush.msra.mxu1 %v970_v56  ;;  %1045 = vmatpush.msrb.mxu2 %v1044_v41  ;;  %v3426_v56 = vsub.f32 %v154_v39, %v3403_v18  ;;  %v3452_v63 = vsub.f32 %v152_v19, %v3420_v24  ;;  %v3490_v39 = vsub.f32 %v150_v54, %v3457_v4 }
  0x94   :  { %1099 = vmatpush.msrb.mxu3 %v3331_v21  ;;  %1135 = vmatpush.msra.mxu0 %v3235_v52 }
  0x95   :  { %946 = vmatmul.f32.gmra.mxu1 %v945_v2  ;;  %1047 = vmatmul.f32.vlgmr.msrb.gmra.mxu2 %v3264_v44  ;;  %v1342_v20 = vand.u32 4294901760, %v3452_v63  ;;  %v146_v2 = vld [vmem:[%s3942_s4 + $0x1b0] sm:$0xff] }
  0x96   :  { %1178 = vmatpush.msra.mxu1 %v976_v1  ;;  %1233 = vmatpush.msra.mxu2 %v3080_v58  ;;  %v1330_v58 = vand.u32 4294901760, %v3426_v56  ;;  %v149_v1 = vld [vmem:[%s3942_s4 + $0x1c8] sm:$0xff]  ;;  %v3521_v54 = vand.u32 4294901760, %v146_v2 }
  0x97   :  { %1102 = vmatpush.msrb.mxu3 %v3343_v31  ;;  %1137 = vmatpush.msra.mxu0 %v3250_v36  ;;  %v3471_v55 = vand.u32 4294901760, %v149_v1  ;;  %v1343_v19 = vsub.f32 %v3452_v63, %v1342_v20 }
  0x98   :  { %1105 = vmatmul.f32.vlgmr.msrb.gmra.mxu3 %v3297_v46  ;;  %1182 = vmatpush.msra.mxu1 %v982_v14  ;;  %v1336_v14 = vand.u32 4294901760, %v3438_v13  ;;  %v1331_v27 = vsub.f32 %v3426_v56, %v1330_v58 }
  0x99   :  { %1235 = vmatpush.msra.mxu2 %v3095_v8  ;;  %1274 = vmatpush.msra.mxu3 %v3394_v45  ;;  %v1325_v8 = vsub.f32 %v3413_v11, %v1324_v60 }
  0x9a   :  { %1139 = vmatpush.msra.mxu0 %v3267_v6  ;;  %1186 = vmatpush.msra.mxu1 %v988_v53  ;;  %v3477_v53 = vsub.f32 %v151_v61, %v3443_v38  ;;  %v1337_v41 = vsub.f32 %v3438_v13, %v1336_v14  ;;  %v145_v61 = vld [vmem:[%s3942_s4 + $0x1a8] sm:$0xff] }
  0x9b   :  { %1237 = vmatpush.msra.mxu2 %v3108_v25  ;;  %1276 = vmatpush.msra.mxu3 %v3403_v18  ;;  %v147_v25 = vld [vmem:[%s3942_s4 + $0x1b8] sm:$0xff]  ;;  %v3537_v28 = vand.u32 4294901760, %v145_v61 }
  0x9c   :  { %1141 = vmatpush.msra.mxu0 %v3282_v30  ;;  %1190 = vmatpush.msra.mxu1 %v994_v26  ;;  %v3487_v26 = vand.u32 4294901760, %v148_v29  ;;  %v3498_v9 = vand.u32 4294901760, %v147_v25  ;;  %v1348_v48 = vand.u32 4294901760, %v3477_v53 }
  0x9d   :  { %1239 = vmatpush.msra.mxu2 %v3117_v37  ;;  %1278 = vmatpush.msra.mxu3 %v3415_v51  ;;  %v1326_v37 = vand.u32 4294901760, %v1325_v8 }
  0x9e   :  { %1143 = vmatpush.msra.mxu0 %v3301_v16  ;;  %1051 = vmatmul.f32.gmra.mxu2 %v3333_v59  ;;  %v3525_v46 = vsub.f32 %v148_v29, %v3487_v26  ;;  %v3529_v8 = vsub.f32 %v147_v25, %v3498_v9  ;;  %v144_v29 = vld [vmem:[%s3942_s4 + $0x1a0] sm:$0xff]  ;;  %v1344_v25 = vand.u32 4294901760, %v1343_v19  ;;  %v3586_v19 = vand.u32 4294901760, %v143_v40 }
  0x9f   :  { %1194 = vmatpush.msra.mxu1 %v1000_v57  ;;  %1241 = vmatpush.msra.mxu2 %v3128_v3  ;;  %v3507_v57 = vsub.f32 %v149_v1, %v3471_v55  ;;  %v1332_v3 = vand.u32 4294901760, %v1331_v27  ;;  %v1354_v1 = vand.u32 4294901760, %v3490_v39  ;;  %v3555_v27 = vsub.f32 %v146_v2, %v3521_v54 }
  0xa0   :  { %1280 = vmatpush.msra.mxu3 %v3420_v24  ;;  %1145 = vmatpush.msra.mxu0 %v3316_v12  ;;  %v3571_v2 = vsub.f32 %v145_v61, %v3537_v28 }
  0xa1   :  { %1110 = vmatmul.f32.gmra.mxu3 %v3356_v62  ;;  %1149 = vmatmul.f32.vlgmr.msra.gmra.mxu0 %v935_v0  ;;  %v1338_v0 = vand.u32 4294901760, %v1337_v41  ;;  %v1355_v42 = vsub.f32 %v3490_v39, %v1354_v1  ;;  %v1378_v61 = vand.u32 4294901760, %v3555_v27 }
  0xa2   :  { %1198 = vmatpush.msra.mxu1 %v1006_v17  ;;  %1243 = vmatpush.msra.mxu2 %v3153_v32  ;;  %v1349_v32 = vsub.f32 %v3477_v53, %v1348_v48  ;;  %v1360_v17 = vand.u32 4294901760, %v3507_v57 }
  0xa3   :  { %1282 = vmatpush.msra.mxu3 %v3443_v38  ;;  %1327 = vmatpush.msrb.mxu0 %v1326_v37  ;;  %v3558_v37 = vand.u32 4294901760, %v144_v29 }
  0xa4   :  { %1202 = vmatpush.msra.mxu1 %v1012_v47  ;;  %1245 = vmatpush.msra.mxu2 %v3167_v34  ;;  %v87_v34 = vld [vmem:[%s3939_s1 + $0x18] sm:$0xff]  ;;  %v1366_v47 = vand.u32 4294901760, %v3525_v46  ;;  %v1361_v41 = vsub.f32 %v3507_v57, %v1360_v17 }
  0xa5   :  { %1284 = vmatpush.msra.mxu3 %v3457_v4  ;;  %1333 = vmatpush.msrb.mxu0 %v1332_v3  ;;  %v3573_v3 = vand.u32 4294901760, %v87_v34 }
  0xa6   :  { %1206 = vmatpush.msra.mxu1 %v1018_v23  ;;  %1247 = vmatpush.msra.mxu2 %v3181_v7  ;;  %v1372_v7 = vand.u32 4294901760, %v3529_v8  ;;  %v1350_v23 = vand.u32 4294901760, %v1349_v32 }
  0xa7   :  { %1286 = vmatpush.msra.mxu3 %v3471_v55  ;;  %1339 = vmatpush.msrb.mxu0 %v1338_v0  ;;  %v3602_v0 = vand.u32 4294901760, %v142_v35  ;;  %v3606_v32 = vsub.f32 %v87_v34, %v3573_v3  ;;  %v3621_v34 = vsub.f32 %v143_v40, %v3586_v19 }
  0xa8   :  { %1210 = vmatpush.msra.mxu1 %v1024_v5  ;;  %1249 = vmatpush.msra.mxu2 %v3195_v10  ;;  %v1356_v10 = vand.u32 4294901760, %v1355_v42  ;;  %v1367_v5 = vsub.f32 %v3525_v46, %v1366_v47  ;;  %v1373_v62 = vsub.f32 %v3529_v8, %v1372_v7 }
  0xa9   :  { %1288 = vmatpush.msra.mxu3 %v3487_v26  ;;  %1345 = vmatpush.msrb.mxu0 %v1344_v25  ;;  %v3618_v25 = vand.u32 4294901760, %v141_v49 }
  0xaa   :  { %1155 = vmatmul.f32.gmra.mxu0 %v943_v50  ;;  %1214 = vmatpush.msra.mxu1 %v1030_v22  ;;  %v3598_v22 = vsub.f32 %v144_v29, %v3558_v37  ;;  %v1362_v50 = vand.u32 4294901760, %v1361_v41  ;;  %v140_v29 = vld [vmem:[%s3942_s4 + $0x180] sm:$0xff]  ;;  %v1368_v21 = vand.u32 4294901760, %v1367_v5  ;;  %v1374_v31 = vand.u32 4294901760, %v1373_v62 }
  0xab   :  { %1251 = vmatpush.msra.mxu2 %v3223_v33  ;;  %1290 = vmatpush.msra.mxu3 %v3498_v9  ;;  %v1384_v33 = vand.u32 4294901760, %v3571_v2  ;;  %v3633_v40 = vand.u32 4294901760, %v140_v29  ;;  %v3637_v41 = vsub.f32 %v142_v35, %v3602_v0  ;;  %v3952_v62 = vand.u32 4294901760, %v3621_v34 }
  0xac   :  { %1351 = vmatpush.msrb.mxu0 %v1350_v23  ;;  %1218 = vmatpush.msra.mxu1 %v1036_v15  ;;  %v1379_v15 = vsub.f32 %v3555_v27, %v1378_v61  ;;  %v3951_v23 = vand.u32 4294901760, %v3606_v32 }
  0xad   :  { %1253 = vmatpush.msra.mxu2 %v3235_v52  ;;  %1292 = vmatpush.msra.mxu3 %v3521_v54  ;;  %v91_v52 = vld [vmem:[%s3939_s1 + $0x38] sm:$0xff]  ;;  %v1385_v42 = vsub.f32 %v3571_v2, %v1384_v33 }
  0xae   :  { %1357 = vmatpush.msrb.mxu0 %v1356_v10  ;;  %1222 = vmatpush.msra.mxu1 %v1042_v43  ;;  %v3950_v43 = vand.u32 4294901760, %v3598_v22  ;;  %v3643_v10 = vand.u32 4294901760, %v91_v52  ;;  %v1380_v5 = vand.u32 4294901760, %v1379_v15  ;;  %v3953_v15 = vand.u32 4294901760, %v3637_v41 }
  0xaf   :  { %1255 = vmatpush.msra.mxu2 %v3250_v36  ;;  %1294 = vmatpush.msra.mxu3 %v3537_v28  ;;  %v3641_v36 = vpop.f32.mrf.mxu0  ;;  %v1386_v35 = vand.u32 4294901760, %v1385_v42 }
  0xb0   :  { %1363 = vmatpush.msrb.mxu0 %v1362_v50  ;;  %1224 = vmatmul.f32.vlgmr.msra.gmra.mxu1 %v3264_v44  ;;  %v3648_v50 = vsub.f32 %v141_v49, %v3618_v25  ;;  %v3661_v49 = vsub.f32 %v140_v29, %v3633_v40  ;;  %v3676_v29 = vld [vmem:[%s3944_s6 + $0x2] ss:$0 sm:$0xff] }
  0xb1   :  { %1429 = vmatpush.msrb.mxu1 %v3413_v11  ;;  %1257 = vmatpush.msra.mxu2 %v3267_v6  ;;  %v1391_v6 = vsub.f32 %v3598_v22, %v3950_v43 }
  0xb2   :  { %1296 = vmatpush.msra.mxu3 %v3558_v37  ;;  %1369 = vmatpush.msrb.mxu0 %v1368_v21  ;;  %v1308_v21 = vsub.f32 %v3606_v32, %v3951_v23  ;;  %v195_v43 = vpop.f32.mrf.mxu1  ;;  %v1408_v42 = vand.u32 4294901760, %v3648_v50  ;;  %v1414_v23 = vand.u32 4294901760, %v3661_v49 }
  0xb3   :  { %1432 = vmatpush.msrb.mxu1 %v3426_v56  ;;  %1259 = vmatpush.msra.mxu2 %v3282_v30  ;;  %v3666_v30 = vsub.f32 %v91_v52, %v3643_v10 }
  0xb4   :  { %1298 = vmatpush.msra.mxu3 %v3586_v19  ;;  %1375 = vmatpush.msrb.mxu0 %v1374_v31  ;;  %v1397_v31 = vsub.f32 %v3621_v34, %v3952_v62  ;;  %v1309_v52 = vand.u32 4294901760, %v1308_v21 }
  0xb5   :  { %1435 = vmatpush.msrb.mxu1 %v3438_v13  ;;  %1261 = vmatpush.msra.mxu2 %v3301_v16  ;;  %v1392_v16 = vand.u32 4294901760, %v1391_v6  ;;  %v1315_v62 = vand.u32 4294901760, %v3666_v30  ;;  %v1409_v6 = vsub.f32 %v3648_v50, %v1408_v42 }
  0xb6   :  { %1300 = vmatpush.msra.mxu3 %v3602_v0  ;;  %1381 = vmatpush.msrb.mxu0 %v1380_v5  ;;  %v1403_v5 = vsub.f32 %v3637_v41, %v3953_v15  ;;  %v1415_v15 = vsub.f32 %v3661_v49, %v1414_v23 }
  0xb7   :  { %1438 = vmatpush.msrb.mxu1 %v3452_v63  ;;  %1263 = vmatpush.msra.mxu2 %v3316_v12  ;;  %v1398_v12 = vand.u32 4294901760, %v1397_v31  ;;  %v3695_v21 = vpop.f32.mrf.mxu0 }
  0xb8   :  { %1302 = vmatpush.msra.mxu3 %v3618_v25  ;;  %1387 = vmatpush.msrb.mxu0 %v1386_v35  ;;  %v196_v35 = vadd.f32 %v3676_v29, %v195_v43  ;;  %v1316_v43 = vsub.f32 %v3666_v30, %v1315_v62  ;;  %v1416_v11 = vand.u32 4294901760, %v1415_v15 }
  0xb9   :  { %1228 = vmatmul.f32.gmra.mxu1 %v3333_v59  ;;  %1265 = vmatmul.f32.vlgmr.msra.gmra.mxu2 %v3264_v44  ;;  %v1404_v44 = vand.u32 4294901760, %v1403_v5 }
  0xba   :  { %1441 = vmatpush.msrb.mxu1 %v3477_v53  ;;  %1487 = vmatpush.msrb.mxu2 %v3394_v45  ;;  %v304_v31 = vpop.f32.mrf.mxu2  ;;  %v2311_v53 = vld [vmem:[%s3941_s3] sm:$0xff] }
  0xbb   :  { %1304 = vmatpush.msra.mxu3 %v3633_v40  ;;  %1393 = vmatpush.msrb.mxu0 %v1392_v16  ;;  %v1410_v16 = vand.u32 4294901760, %v1409_v6 }
  0xbc   :  { %1310 = vmatmul.f32.vlgmr.msra.gmra.mxu3 %v1309_v52  ;;  %1444 = vmatpush.msrb.mxu1 %v3490_v39  ;;  %v305_v52 = vadd.f32 %v304_v31, %v196_v35 }
  0xbd   :  { %1489 = vmatpush.msrb.mxu2 %v3403_v18  ;;  %1534 = vmatpush.msrb.mxu3 %v1324_v60  ;;  %v1317_v60 = vand.u32 4294901760, %v1316_v43 }
  0xbe   :  { %1399 = vmatpush.msrb.mxu0 %v1398_v12  ;;  %1447 = vmatpush.msrb.mxu1 %v3507_v57  ;;  %v203_v5 = vpop.f32.mrf.mxu1  ;;  %v362_v12 = vpop.f32.mrf.mxu3 }
  0xbf   :  { %1491 = vmatpush.msrb.mxu2 %v3415_v51  ;;  %1538 = vmatpush.msrb.mxu3 %v1330_v58  ;;  %v363_v6 = vadd.f32 %v362_v12, %v305_v52 }
  0xc0   :  { %1405 = vmatpush.msrb.mxu0 %v1404_v44  ;;  %1450 = vmatpush.msrb.mxu1 %v3525_v46 }
  0xc1   :  { %1493 = vmatpush.msrb.mxu2 %v3420_v24  ;;  %1542 = vmatpush.msrb.mxu3 %v1336_v14  ;;  %v2351_v14 = vld [vmem:[%s3944_s6] ss:$0 sm:$0xff] }
  0xc2   :  { %1411 = vmatpush.msrb.mxu0 %v1410_v16  ;;  %1269 = vmatmul.f32.gmra.mxu2 %v3333_v59  ;;  %v406_v56 = vpop.f32.mrf.mxu0  ;;  %v3780_v57 = vadd.f32 %v2351_v14, %v3641_v36 }
  0xc3   :  { %1453 = vmatpush.msrb.mxu1 %v3529_v8  ;;  %1495 = vmatpush.msrb.mxu2 %v3443_v38  ;;  %v407_v13 = vadd.f32 %v406_v56, %v363_v6 }
  0xc4   :  { %1546 = vmatpush.msrb.mxu3 %v1342_v20  ;;  %1417 = vmatpush.msrb.mxu0 %v1416_v11 }
  0xc5   :  { %1318 = vmatmul.f32.gmra.mxu3 %v1317_v60  ;;  %1419 = vmatmul.f32.vlgmr.msrb.gmra.mxu0 %v3573_v3 }
  0xc6   :  { %1456 = vmatpush.msrb.mxu1 %v3555_v27  ;;  %1497 = vmatpush.msrb.mxu2 %v3457_v4 }
  0xc7   :  { %1550 = vmatpush.msrb.mxu3 %v1348_v48  ;;  %1605 = vmatpush.msra.mxu0 %v3394_v45  ;;  %v204_v45 = vadd.f32 %v3676_v29, %v203_v5  ;;  %v3960_v48 = vand.u32 4294901760, %v3637_v41 }
  0xc8   :  { %1459 = vmatpush.msrb.mxu1 %v3571_v2  ;;  %1499 = vmatpush.msrb.mxu2 %v3471_v55 }
  0xc9   :  { %1554 = vmatpush.msrb.mxu3 %v1354_v1  ;;  %1607 = vmatpush.msra.mxu0 %v3403_v18  ;;  %v481_v59 = vpop.f32.mrf.mxu1  ;;  %v308_v18 = vpop.f32.mrf.mxu2  ;;  %v3783_v1 = vadd.f32 %v2351_v14, %v3695_v21 }
  0xca   :  { %1462 = vmatpush.msrb.mxu1 %v3598_v22  ;;  %1501 = vmatpush.msrb.mxu2 %v3487_v26  ;;  %v482_v58 = vadd.f32 %v481_v59, %v407_v13 }
  0xcb   :  { %1558 = vmatpush.msrb.mxu3 %v1360_v17  ;;  %1609 = vmatpush.msra.mxu0 %v3415_v51  ;;  %v309_v51 = vadd.f32 %v308_v18, %v204_v45  ;;  %v3961_v17 = vand.u32 4294901760, %v3606_v32  ;;  %v83_v27 = vmax.f32 %v3783_v1, 0.0 }
  0xcc   :  { %1465 = vmatpush.msrb.mxu1 %v3621_v34  ;;  %1503 = vmatpush.msrb.mxu2 %v3498_v9  ;;  %v412_v20 = vpop.f32.mrf.mxu0 }
  0xcd   :  { %1562 = vmatpush.msrb.mxu3 %v1366_v47  ;;  %1611 = vmatpush.msra.mxu0 %v3420_v24  ;;  %v2312_v24 = vld [vmem:[%s3941_s3 + $0x8] sm:$0xff]  ;;  %v82_v47 = vmax.f32 %v3780_v57, 0.0 }
  0xce   :  { %1423 = vmatmul.f32.gmra.mxu0 %v3643_v10  ;;  %1468 = vmatpush.msrb.mxu1 %v3637_v41 }
  0xcf   :  { %1505 = vmatpush.msrb.mxu2 %v3521_v54  ;;  %1566 = vmatpush.msrb.mxu3 %v1372_v7  ;;  %v1651_v2 = vpack.c.bf16 %v83_v27, %v82_v47 }
  0xd0   :  { %1613 = vmatpush.msra.mxu0 %v3443_v38  ;;  %1471 = vmatpush.msrb.mxu1 %v3648_v50  ;;  %v367_v38 = vpop.f32.mrf.mxu3 }
  0xd1   :  { %1507 = vmatpush.msrb.mxu2 %v3537_v28  ;;  %1570 = vmatpush.msrb.mxu3 %v1378_v61  ;;  %v368_v63 = vadd.f32 %v367_v38, %v309_v51 }
  0xd2   :  { %1615 = vmatpush.msra.mxu0 %v3457_v4  ;;  %1474 = vmatpush.msrb.mxu1 %v3661_v49  ;;  %v3958_v4 = vand.u32 4294901760, %v3598_v22 }
  0xd3   :  { %1509 = vmatpush.msrb.mxu2 %v3558_v37  ;;  %1574 = vmatpush.msrb.mxu3 %v1384_v33  ;;  %v413_v39 = vadd.f32 %v412_v20, %v368_v63 }
  0xd4   :  { %1617 = vmatpush.msra.mxu0 %v3471_v55  ;;  %1477 = vmatmul.f32.vlgmr.msrb.gmra.mxu1 %v3606_v32  ;;  %v3959_v55 = vand.u32 4294901760, %v3621_v34 }
  0xd5   :  { %1511 = vmatpush.msrb.mxu2 %v3586_v19  ;;  %1578 = vmatpush.msrb.mxu3 %v3958_v4  ;;  %v676_v7 = vpop.f32.mrf.mxu0 }
  0xd6   :  { %1619 = vmatpush.msra.mxu0 %v3487_v26  ;;  %1679 = vmatpush.bf16.msra.mxu1 %v2312_v24  ;;  %v522_v26 = vpop.f32.mrf.mxu2 }
  0xd7   :  { %1513 = vmatpush.msrb.mxu2 %v3602_v0  ;;  %1582 = vmatpush.msrb.mxu3 %v3959_v55  ;;  %v523_v46 = vadd.f32 %v522_v26, %v482_v58  ;;  %v2353_v58 = vld [vmem:[%s3944_s6 + $0x1] ss:$0 sm:$0xff] }
  0xd8   :  { %1621 = vmatpush.msra.mxu0 %v3498_v9 }
  0xd9   :  { %1515 = vmatpush.msrb.mxu2 %v3618_v25  ;;  %1586 = vmatpush.msrb.mxu3 %v3960_v48 }
  0xda   :  { %1623 = vmatpush.msra.mxu0 %v3521_v54  ;;  %1680 = vmatpush.bf16.msra.mxu1 %v2311_v53  ;;  %v567_v54 = vpop.f32.mrf.mxu3 }
  0xdb   :  { %1517 = vmatpush.msrb.mxu2 %v3633_v40  ;;  %1590 = vmatpush.msrb.mxu3 %v1408_v42  ;;  %v485_v9 = vpop.f32.mrf.mxu1 }
  0xdc   :  { %1625 = vmatpush.msra.mxu0 %v3537_v28  ;;  %1482 = vmatmul.f32.gmra.mxu1 %v3666_v30  ;;  %v486_v8 = vadd.f32 %v485_v9, %v413_v39  ;;  %v568_v28 = vadd.f32 %v567_v54, %v523_v46 }
  0xdd   :  { %1521 = vmatmul.f32.vlgmr.msrb.gmra.mxu2 %v3961_v17  ;;  %1594 = vmatpush.msrb.mxu3 %v1414_v23 }
  0xde   :  { %1627 = vmatpush.msra.mxu0 %v3558_v37  ;;  %1596 = vmatmul.f32.vlgmr.msrb.gmra.mxu3 %v3573_v3  ;;  %v677_v61 = vadd.f32 %v676_v7, %v568_v28 }
  0xe0   :  { %1629 = vmatpush.msra.mxu0 %v3586_v19 }
  0xe2   :  { %1631 = vmatpush.msra.mxu0 %v3602_v0 }
  0xe4   :  { %1633 = vmatpush.msra.mxu0 %v3618_v25  ;;  %2258 = vmatmul.msk.bf16.vlgmr.msra.gmra.mxu1 %vm1669_vm1, %v1651_v2 }
  0xe5   :  { %1527 = vmatmul.f32.gmra.mxu2 %v1315_v62  ;;  %v734_v37 = vpop.f32.mrf.mxu1 }
  0xe6   :  { %1635 = vmatpush.msra.mxu0 %v3633_v40  ;;  %1600 = vmatmul.f32.gmra.mxu3 %v3643_v10  ;;  %v735_v19 = vadd.f32 %v734_v37, %v677_v61  ;;  %v526_v22 = vpop.f32.mrf.mxu2 }
  0xe7   :  { %1637 = vmatmul.f32.vlgmr.msra.gmra.mxu0 %v3573_v3  ;;  %v527_v33 = vadd.f32 %v526_v22, %v486_v8 }
  0xe8   :  { %v575_v32 = vpop.f32.mrf.mxu3 }
  0xe9   :  { %v576_v0 = vadd.f32 %v575_v32, %v527_v33 }
  0xec   :  { %v680_v34 = vpop.f32.mrf.mxu0 }
  0xed   :  { %v681_v25 = vadd.f32 %v680_v34, %v576_v0 }
  0xee   :  { %v739_v23 = vpop.f32.mrf.mxu1 }
  0xef   :  { %1641 = vmatmul.f32.gmra.mxu0 %v3643_v10  ;;  %v740_v41 = vadd.f32 %v739_v23, %v681_v25 }
  0xf4   :  { %v778_v50 = vpop.f32.mrf.mxu2 }
  0xf5   :  { %v779_v44 = vadd.f32 %v778_v50, %v735_v19 }
  0xf7   :  { %v853_v15 = vpop.f32.mrf.mxu3 }
  0xf8   :  { %v854_v16 = vadd.f32 %v853_v15, %v779_v44 }
  0xfa   :  { %v894_v49 = vpop.f32.mrf.mxu0 }
  0xfb   :  { %v895_v5 = vadd.f32 %v894_v49, %v854_v16 }
  0xfd   :  { %v784_v30 = vpop.f32.mrf.mxu2 }
  0xfe   :  { %v785_v10 = vadd.f32 %v784_v30, %v740_v41 }
 0x100   :  { %v857_v42 = vpop.f32.mrf.mxu3 }
 0x101   :  { %v858_v6 = vadd.f32 %v857_v42, %v785_v10 }
 0x103   :  { %v898_v35 = vpop.f32.mrf.mxu0 }
 0x104   :  { %v899_v45 = vadd.f32 %v898_v35, %v858_v6 }
 0x109   :  { %v939_v36 = vpop.f32.mrf.mxu1 }
 0x10a   :  { %v940_v60 = vadd.f32 %v939_v36, %v895_v5 }
 0x112   :  { %v947_v62 = vpop.f32.mrf.mxu1 }
 0x113   :  { %v948_v24 = vadd.f32 %v947_v62, %v899_v45 }
 0x118   :  { %v1048_v3 = vpop.f32.mrf.mxu2 }
 0x119   :  { %v1049_v56 = vadd.f32 %v1048_v3, %v940_v60 }
 0x11b   :  { %v1106_v21 = vpop.f32.mrf.mxu3 }
 0x11c   :  { %v1107_v18 = vadd.f32 %v1106_v21, %v1049_v56 }
 0x11e   :  { %v1150_v31 = vpop.f32.mrf.mxu0 }
 0x11f   :  { %v1151_v4 = vadd.f32 %v1150_v31, %v1107_v18 }
 0x121   :  { %v1052_v52 = vpop.f32.mrf.mxu2 }
 0x122   :  { %v1053_v14 = vadd.f32 %v1052_v52, %v948_v24 }
 0x124   :  { %v1111_v11 = vpop.f32.mrf.mxu3 }
 0x125   :  { %v1112_v26 = vadd.f32 %v1111_v11, %v1053_v14 }
 0x127   :  { %v1156_v13 = vpop.f32.mrf.mxu0 }
 0x128   :  { %v1157_v54 = vadd.f32 %v1156_v13, %v1112_v26 }
 0x12d   :  { %v1225_v40 = vpop.f32.mrf.mxu1 }
 0x12e   :  { %v1226_v20 = vadd.f32 %v1225_v40, %v1151_v4 }
 0x136   :  { %v1229_v29 = vpop.f32.mrf.mxu1 }
 0x137   :  { %v1230_v2 = vadd.f32 %v1229_v29, %v1157_v54 }
 0x13c   :  { %v1266_v59 = vpop.f32.mrf.mxu2 }
 0x13d   :  { %v1267_v9 = vadd.f32 %v1266_v59, %v1226_v20 }
 0x13f   :  { %v1311_v51 = vpop.f32.mrf.mxu3 }
 0x140   :  { %v1312_v28 = vadd.f32 %v1311_v51, %v1267_v9 }
 0x142   :  { %v1420_v53 = vpop.f32.mrf.mxu0 }
 0x143   :  { %v1421_v22 = vadd.f32 %v1420_v53, %v1312_v28 }
 0x145   :  { %v1270_v39 = vpop.f32.mrf.mxu2 }
 0x146   :  { %v1271_v33 = vadd.f32 %v1270_v39, %v1230_v2 }
 0x148   :  { %v1319_v8 = vpop.f32.mrf.mxu3 }
 0x149   :  { %v1320_v34 = vadd.f32 %v1319_v8, %v1271_v33 }
 0x14b   :  { %v1424_v61 = vpop.f32.mrf.mxu0 }
 0x14c   :  { %v1425_v41 = vadd.f32 %v1424_v61, %v1320_v34 }
 0x151   :  { %v1478_v43 = vpop.f32.mrf.mxu1 }
 0x152   :  { %v1479_v32 = vadd.f32 %v1478_v43, %v1421_v22 }
 0x159   :  { %v1483_v12 = vpop.f32.mrf.mxu1 }
 0x15a   :  { %v1484_v50 = vadd.f32 %v1483_v12, %v1425_v41 }
 0x160   :  { %v1522_v37 = vpop.f32.mrf.mxu2 }
 0x161   :  { %v1682_v38 = vpop.f32.mrf.mxu1  ;;  %v1597_v0 = vpop.f32.mrf.mxu3  ;;  %v1523_v25 = vadd.f32 %v1522_v37, %v1479_v32 }
 0x162   :  { %v3816_v63 = vadd.f32 %v2353_v58, %v1682_v38 }
 0x163   :  { %v1598_v36 = vadd.f32 %v1597_v0, %v1523_v25 }
 0x164   :  { %v1687_v55 = vpack.c.bf16 %v3816_v63, %v3816_v63  ;;  %v1638_v23 = vpop.f32.mrf.mxu0 }
 0x165   :  { %v1639_v15 = vadd.f32 %v1638_v23, %v1598_v36 }
 0x166   :  { %1741 = vrot.lane.b32.xlu2 %v1687_v55, %s2417_s11  ;;  %1743 = vrot.lane.b32.xlu1 %v1687_v55, %s2418_s12  ;;  %v3823_v48 = vsel %vm1724_vm2, %v1687_v55, 0 }
 0x167   :  { %1691 = vrot.lane.b32.xlu0 %v1687_v55, %s2419_s13  ;;  %1786 = vmatpush.bf16.msrb.mxu1 %v3823_v48  ;;  %v1645_v30 = vmax.f32 %v1639_v15, 1e-06 }
 0x168   :  { %v1528_v62 = vpop.f32.mrf.mxu2 }
 0x169   :  { %v1684_v46 = vpop.f32.mrf.mxu1  ;;  %v1529_v40 = vadd.f32 %v1528_v62, %v1484_v50  ;;  %v1601_v49 = vpop.f32.mrf.mxu3  ;;  %2355 = vlog2.f32 %v1645_v30 }
 0x16a   :  { %v3828_v17 = vadd.f32 %v2353_v58, %v1684_v46 }
 0x16b   :  { %1886 = vmatpush.bf16.msra.mxu1 %v3823_v48  ;;  %v1602_v42 = vadd.f32 %v1601_v49, %v1529_v40 }
 0x16c   :  { %v1909_v7 = vpack.c.bf16 %v3828_v17, %v3828_v17  ;;  %v1642_v29 = vpop.f32.mrf.mxu0 }
 0x16d   :  { %v1643_v35 = vadd.f32 %v1642_v29, %v1602_v42 }
 0x16e   :  { %1792 = vrot.lane.b32.xlu2 %v1687_v55, %s2420_s14  ;;  %1794 = vrot.lane.b32.xlu1 %v1687_v55, %s2421_s15  ;;  %v3834_v19 = vsel %vm1724_vm2, %v1909_v7, 0 }
 0x16f   :  { %1689 = vrot.lane.b32.xlu0 %v1687_v55, %s2422_s16  ;;  %v1646_v3 = vmax.f32 %v1643_v35, 1e-06  ;;  %v2356_v21 = vpop.eup %2355 }
 0x170   :  { %v1648_v44 = vmul.f32 0.6931472, %v2356_v21 }
 0x171   :  { %2357 = vlog2.f32 %v1646_v3 }
 0x176   :  { %1842 = vrot.lane.b32.xlu2 %v1687_v55, %s2423_s17  ;;  %1913 = vrot.lane.b32.xlu1 %v1909_v7, %s2419_s13 }
 0x177   :  { %1844 = vrot.lane.b32.xlu0 %v1687_v55, %s2424_s18  ;;  %v2358_v43 = vpop.eup %2357 }
 0x178   :  { %v3844_v31 = vmul.f32 0.6931472, %v2358_v43 }
 0x17e   :  { %2014 = vrot.lane.b32.xlu2 %v1909_v7, %s2421_s15  ;;  %1963 = vrot.lane.b32.xlu1 %v1909_v7, %s2418_s12  ;;  %s2429_s12 = smov [#allocation2]  }
 0x17f   :  { %1911 = vrot.lane.b32.xlu0 %v1909_v7, %s2422_s16 }
 0x186   :  { %2064 = vrot.lane.b32.xlu2 %v1909_v7, %s2424_s18  ;;  %2012 = vrot.lane.b32.xlu1 %v1909_v7, %s2420_s14 }
 0x187   :  { %1961 = vrot.lane.b32.xlu0 %v1909_v7, %s2417_s11 }
 0x18e   :  { %1796 = vrot.lane.b32.xlu2 %v1648_v44, %s2425_s19  ;;  %1746 = vrot.lane.b32.xlu1 %v1648_v44, %s2426_s20 }
 0x18f   :  { %2062 = vrot.lane.b32.xlu0 %v1909_v7, %s2423_s17  ;;  %s2431_s17 = smov 8  }
 0x196   :  { %2016 = vrot.lane.b32.xlu2 %v3844_v31, %s2425_s19  ;;  %1966 = vrot.lane.b32.xlu1 %v3844_v31, %s2426_s20 }
 0x197   :  { %1846 = vrot.lane.b32.xlu0 %v1648_v44, %s2427_s21 }
 0x19e   :  { %2066 = vrot.lane.b32.xlu1 %v3844_v31, %s2427_s21 }
 0x1c0   :  { %v1742_v16 = vpop.permute.xlu2 %1741 }
 0x1c8   :  { %v1793_v52 = vpop.permute.xlu2 %1792 }
 0x1d0   :  { %v1843_v12 = vpop.permute.xlu2 %1842 }
 0x1d8   :  { %v1744_v5 = vpop.permute.xlu1 %1743  ;;  %v2015_v59 = vpop.permute.xlu2 %2014 }
 0x1d9   :  { %v1753_v10 = vsel %vm1693_vm3, %v1744_v5, 0  ;;  %v1692_v11 = vpop.permute.xlu0 %1691  ;;  %v2023_v51 = vsel %vm1693_vm3, %v2015_v59, 0 }
 0x1da   :  { %v1698_v60 = vsel %vm1693_vm3, %v1692_v11, 0  ;;  %1762 = vmatpush.bf16.xpose.msrb.mxu0 %v1753_v10 }
 0x1db   :  { %1707 = vmatpush.bf16.xpose.msra.mxu3 %v1698_v60 }
 0x1e0   :  { %v1795_v6 = vpop.permute.xlu1 %1794  ;;  %v2065_v38 = vpop.permute.xlu2 %2064 }
 0x1e1   :  { %v1803_v56 = vsel %vm1693_vm3, %v1795_v6, 0  ;;  %v1690_v13 = vpop.permute.xlu0 %1689  ;;  %2261 = vmatmul.msk.bf16.vlgmr.msrb.gmra.mxu0 %vm1693_vm3, %v1742_v16  ;;  %v2073_v53 = vsel %vm1693_vm3, %v2065_v38, 0 }
 0x1e2   :  { %2259 = vmatmul.msk.bf16.vlgmr.msra.gmra.mxu3 %vm1693_vm3, %v1690_v13  ;;  %1812 = vmatpush.bf16.xpose.msra.mxu2 %v1803_v56 }
 0x1e3   :  { %1735 = vmatpush.bf16.msrb.mxu3 %v3823_v48 }
 0x1e7   :  { %1836 = vmatpush.bf16.msra.mxu3 %v3823_v48 }
 0x1e8   :  { %v1914_v58 = vpop.permute.xlu1 %1913  ;;  %v1797_v22 = vpop.permute.xlu2 %1796 }
 0x1e9   :  { %v1919_v45 = vsel %vm1693_vm3, %v1914_v58, 0  ;;  %v1845_v18 = vpop.permute.xlu0 %1844  ;;  %2263 = vmatmul.msk.bf16.vlgmr.msra.gmra.mxu2 %vm1693_vm3, %v1793_v52 }
 0x1ea   :  { %v1853_v24 = vsel %vm1693_vm3, %v1845_v18, 0  ;;  %1928 = vmatpush.bf16.xpose.msrb.mxu2 %v1919_v45 }
 0x1eb   :  { %1862 = vmatpush.bf16.xpose.msra.mxu0 %v1853_v24 }
 0x1f0   :  { %v1964_v4 = vpop.permute.xlu1 %1963  ;;  %v2017_v56 = vpop.permute.xlu2 %2016 }
 0x1f1   :  { %v1973_v14 = vsel %vm1693_vm3, %v1964_v4, 0  ;;  %v1912_v55 = vpop.permute.xlu0 %1911 }
 0x1f2   :  { %2032 = vmatpush.bf16.xpose.msra.mxu2 %v2023_v51  ;;  %2265 = vmatmul.msk.bf16.vlgmr.msra.gmra.mxu0 %vm1693_vm3, %v1843_v12 }
 0x1f3   :  { %1982 = vmatpush.bf16.xpose.msrb.mxu0 %v1973_v14 }
 0x1f8   :  { %v2013_v39 = vpop.permute.xlu1 %2012 }
 0x1f9   :  { %2267 = vmatmul.msk.bf16.vlgmr.msrb.gmra.mxu2 %vm1693_vm3, %v1912_v55  ;;  %v1962_v20 = vpop.permute.xlu0 %1961 }
 0x1fb   :  { %2082 = vmatpush.bf16.xpose.msra.mxu0 %v2073_v53 }
 0x200   :  { %v1747_v26 = vpop.permute.xlu1 %1746 }
 0x201   :  { %v2063_v48 = vpop.permute.xlu0 %2062 }
 0x202   :  { %2269 = vmatmul.msk.bf16.vlgmr.msrb.gmra.mxu0 %vm1693_vm3, %v1962_v20 }
 0x208   :  { %v1967_v21 = vpop.permute.xlu1 %1966 }
 0x209   :  { %2271 = vmatmul.msk.bf16.vlgmr.msra.gmra.mxu2 %vm1693_vm3, %v2013_v39  ;;  %v1847_v34 = vpop.permute.xlu0 %1846 }
 0x210   :  { %v2067_v59 = vpop.permute.xlu1 %2066 }
 0x212   :  { %2273 = vmatmul.msk.bf16.vlgmr.msra.gmra.mxu0 %vm1693_vm3, %v2063_v48 }
 0x25e   :  { %v1764_v9 = vpop.f32.mrf.mxu0 }
 0x25f   :  { %v1765_v46 = vadd.f32 %v1764_v9, %v1747_v26 }
 0x261   :  { %v1768_v8 = vmul.f32 1.442695, %v1765_v46 }
 0x263   :  { %2359 = vpow2.f32 %v1768_v8 }
 0x265   :  { %v1709_v54 = vpop.f32.mrf.mxu3 }
 0x266   :  { %v1710_v28 = vadd.f32 %v1709_v54, %v1648_v44  ;;  %v1766_v7 = vpop.f32.mrf.mxu0 }
 0x268   :  { %v1713_v2 = vmul.f32 1.442695, %v1710_v28 }
 0x269   :  { %v3867_v61 = vpop.eup %2359 }
 0x26a   :  { %2361 = vpow2.f32 %v1713_v2  ;;  %v1770_v37 = vsel %vm1693_vm3, %v3867_v61, 0.0 }
 0x26b   :  { %1771 = vadd.xlane.f32.xlu2 %v1770_v37 }
 0x26c   :  { %v1814_v33 = vpop.f32.mrf.mxu2 }
 0x26d   :  { %v1711_v32 = vpop.f32.mrf.mxu3  ;;  %v1815_v0 = vadd.f32 %v1814_v33, %v1797_v22 }
 0x26f   :  { %v1818_v25 = vmul.f32 1.442695, %v1815_v0  ;;  %v1864_v23 = vpop.f32.mrf.mxu0 }
 0x270   :  { %v2362_v41 = vpop.eup %2361  ;;  %v1865_v36 = vadd.f32 %v1864_v23, %v1847_v34 }
 0x271   :  { %2363 = vpow2.f32 %v1818_v25  ;;  %v1715_v62 = vsel %vm1693_vm3, %v2362_v41, 0.0 }
 0x272   :  { %v1868_v50 = vmul.f32 1.442695, %v1865_v36  ;;  %1716 = vadd.xlane.f32.xlu0 %v1715_v62 }
 0x274   :  { %2365 = vpow2.f32 %v1868_v50  ;;  %v1816_v15 = vpop.f32.mrf.mxu2 }
 0x277   :  { %v3872_v40 = vpop.eup %2363  ;;  %v1866_v49 = vpop.f32.mrf.mxu0 }
 0x278   :  { %v1820_v30 = vsel %vm1693_vm3, %v3872_v40, 0.0 }
 0x279   :  { %1821 = vadd.xlane.f32.xlu1 %v1820_v30 }
 0x27a   :  { %v2366_v42 = vpop.eup %2365 }
 0x27b   :  { %v1870_v29 = vsel %vm1693_vm3, %v2366_v42, 0.0 }
 0x27c   :  { %1871 = vadd.xlane.f32.xlu2 %v1870_v29  ;;  %v1930_v35 = vpop.f32.mrf.mxu2 }
 0x27d   :  { %v1931_v3 = vadd.f32 %v1930_v35, %v3844_v31 }
 0x27f   :  { %v1934_v44 = vmul.f32 1.442695, %v1931_v3  ;;  %v1984_v43 = vpop.f32.mrf.mxu0 }
 0x280   :  { %v1985_v16 = vadd.f32 %v1984_v43, %v1967_v21 }
 0x281   :  { %2367 = vpow2.f32 %v1934_v44 }
 0x282   :  { %v1988_v52 = vmul.f32 1.442695, %v1985_v16 }
 0x284   :  { %2369 = vpow2.f32 %v1988_v52  ;;  %v1932_v5 = vpop.f32.mrf.mxu2 }
 0x287   :  { %v2368_v10 = vpop.eup %2367  ;;  %v1986_v11 = vpop.f32.mrf.mxu0 }
 0x288   :  { %v1936_v60 = vsel %vm1693_vm3, %v2368_v10, 0.0 }
 0x289   :  { %1937 = vadd.xlane.f32.xlu0 %v1936_v60 }
 0x28a   :  { %v2370_v12 = vpop.eup %2369 }
 0x28b   :  { %v1990_v6 = vsel %vm1693_vm3, %v2370_v12, 0.0 }
 0x28c   :  { %1991 = vadd.xlane.f32.xlu2 %v1990_v6  ;;  %v2034_v13 = vpop.f32.mrf.mxu2 }
 0x28d   :  { %v2035_v31 = vadd.f32 %v2034_v13, %v2017_v56 }
 0x28f   :  { %v2038_v58 = vmul.f32 1.442695, %v2035_v31  ;;  %v2084_v45 = vpop.f32.mrf.mxu0 }
 0x290   :  { %v2085_v18 = vadd.f32 %v2084_v45, %v2067_v59 }
 0x291   :  { %2371 = vpow2.f32 %v2038_v58 }
 0x292   :  { %v2088_v51 = vmul.f32 1.442695, %v2085_v18 }
 0x294   :  { %2373 = vpow2.f32 %v2088_v51  ;;  %v2036_v24 = vpop.f32.mrf.mxu2  ;;  %v2320_v51 = vld [vmem:[%s3943_s5 + $0x38] sm:$0xff] }
 0x295   :  { %2193 = vmatpush.bf16.msrb.mxu2 %v2320_v51  ;;  %v2319_v24 = vld [vmem:[%s3943_s5 + $0x30] sm:$0xff] }
 0x297   :  { %v2372_v38 = vpop.eup %2371  ;;  %v2086_v4 = vpop.f32.mrf.mxu0 }
 0x298   :  { %v2040_v14 = vsel %vm1693_vm3, %v2372_v38, 0.0  ;;  %v2317_v4 = vld [vmem:[%s3943_s5 + $0x20] sm:$0xff] }
 0x299   :  { %2041 = vadd.xlane.f32.xlu0 %v2040_v14  ;;  %2194 = vmatpush.bf16.msrb.mxu2 %v2319_v24  ;;  %v2316_v14 = vld [vmem:[%s3943_s5 + $0x18] sm:$0xff] }
 0x29a   :  { %v2374_v53 = vpop.eup %2373 }
 0x29b   :  { %v2090_v55 = vsel %vm1693_vm3, %v2374_v53, 0.0 }
 0x29c   :  { %2091 = vadd.xlane.f32.xlu1 %v2090_v55  ;;  %v2314_v55 = vld [vmem:[%s3943_s5 + $0x8] sm:$0xff] }
 0x2de   :  { %v1772_v20 = vpop.xlane.xlu2 %1771 }
 0x2df   :  { %2375 = vrcp.f32 %v1772_v20  ;;  %v2313_v20 = vld [vmem:[%s3943_s5] sm:$0xff] }
 0x2e5   :  { %v2376_v39 = vpop.eup %2375  ;;  %v1717_v48 = vpop.xlane.xlu0 %1716 }
 0x2e6   :  { %v1774_v26 = vmul.f32 %v2376_v39, %v3867_v61  ;;  %2377 = vrcp.f32 %v1717_v48 }
 0x2e8   :  { %v1775_v9 = vpack.c.bf16 %v1774_v26, %v1774_v26 }
 0x2ea   :  { %2262 = vmatmul.msk.bf16.vlgmr.msrb.gmra.mxu1 %vm1693_vm3, %v1775_v9 }
 0x2eb   :  { %2006 = vmatpush.bf16.msrb.mxu1 %v3834_v19 }
 0x2ec   :  { %v2378_v46 = vpop.eup %2377  ;;  %v1822_v28 = vpop.xlane.xlu1 %1821 }
 0x2ed   :  { %v1719_v8 = vmul.f32 %v2378_v46, %v2362_v41 }
 0x2ef   :  { %v1720_v54 = vpack.c.bf16 %v1719_v8, %v1719_v8  ;;  %v1872_v7 = vpop.xlane.xlu2 %1871 }
 0x2f0   :  { %2379 = vrcp.f32 %v1872_v7 }
 0x2f1   :  { %2260 = vmatmul.msk.bf16.vlgmr.msrb.gmra.mxu3 %vm1693_vm3, %v1720_v54  ;;  %2381 = vrcp.f32 %v1822_v28 }
 0x2f2   :  { %1955 = vmatpush.bf16.msrb.mxu3 %v3834_v19 }
 0x2f6   :  { %v2380_v2 = vpop.eup %2379 }
 0x2f7   :  { %v1874_v37 = vmul.f32 %v2380_v2, %v2366_v42  ;;  %v2382_v61 = vpop.eup %2381 }
 0x2f8   :  { %v1824_v33 = vmul.f32 %v2382_v61, %v3872_v40 }
 0x2f9   :  { %v1875_v22 = vpack.c.bf16 %v1874_v37, %v1874_v37 }
 0x2fa   :  { %v1825_v32 = vpack.c.bf16 %v1824_v33, %v1824_v33 }
 0x2fb   :  { %2266 = vmatmul.msk.bf16.vlgmr.msra.gmra.mxu1 %vm1693_vm3, %v1875_v22 }
 0x2fc   :  { %2106 = vmatpush.bf16.msra.mxu1 %v3834_v19  ;;  %v1938_v0 = vpop.xlane.xlu0 %1937 }
 0x2ff   :  { %v1992_v34 = vpop.xlane.xlu2 %1991 }
 0x300   :  { %2383 = vrcp.f32 %v1992_v34  ;;  %v2354_v34 = vld [vmem:[%s3944_s6 + $0x3] ss:$0 sm:$0xff]  ;;  %s2221_s6 = sshll.u32 %s3945_s7, 4  ;;  %s2222_s6 = int_to_ptr.hbm [resolvable:$true] %s2221_s6 }
 0x301   :  { %2264 = vmatmul.msk.bf16.vlgmr.msra.gmra.mxu3 %vm1693_vm3, %v1825_v32  ;;  %2385 = vrcp.f32 %v1938_v0 }
 0x302   :  { %2056 = vmatpush.bf16.msra.mxu3 %v3834_v19 }
 0x306   :  { %v2384_v25 = vpop.eup %2383 }
 0x307   :  { %v1994_v23 = vmul.f32 %v2384_v25, %v2370_v12  ;;  %v2386_v41 = vpop.eup %2385 }
 0x308   :  { %v1940_v62 = vmul.f32 %v2386_v41, %v2368_v10 }
 0x309   :  { %v1995_v36 = vpack.c.bf16 %v1994_v23, %v1994_v23 }
 0x30a   :  { %v1941_v50 = vpack.c.bf16 %v1940_v62, %v1940_v62 }
 0x30b   :  { %2270 = vmatmul.msk.bf16.vlgmr.msrb.gmra.mxu1 %vm1693_vm3, %v1995_v36 }
 0x30c   :  { %v2042_v15 = vpop.xlane.xlu0 %2041 }
 0x30f   :  { %v2092_v40 = vpop.xlane.xlu1 %2091 }
 0x310   :  { %2387 = vrcp.f32 %v2092_v40 }
 0x311   :  { %2268 = vmatmul.msk.bf16.vlgmr.msrb.gmra.mxu3 %vm1693_vm3, %v1941_v50  ;;  %2389 = vrcp.f32 %v2042_v15 }
 0x316   :  { %v2388_v49 = vpop.eup %2387 }
 0x317   :  { %v2094_v30 = vmul.f32 %v2388_v49, %v2374_v53  ;;  %v2390_v42 = vpop.eup %2389  ;;  %v2315_v53 = vld [vmem:[%s3943_s5 + $0x10] sm:$0xff] }
 0x318   :  { %v2044_v35 = vmul.f32 %v2390_v42, %v2372_v38  ;;  %v2318_v38 = vld [vmem:[%s3943_s5 + $0x28] sm:$0xff] }
 0x319   :  { %v2095_v29 = vpack.c.bf16 %v2094_v30, %v2094_v30  ;;  %2195 = vmatpush.bf16.msrb.mxu2 %v2318_v38 }
 0x31a   :  { %v2045_v19 = vpack.c.bf16 %v2044_v35, %v2044_v35 }
 0x31b   :  { %2274 = vmatmul.msk.bf16.vlgmr.msra.gmra.mxu1 %vm1693_vm3, %v2095_v29 }
 0x31d   :  { %2196 = vmatpush.bf16.msrb.mxu2 %v2317_v4 }
 0x321   :  { %2272 = vmatmul.msk.bf16.vlgmr.msra.gmra.mxu3 %vm1693_vm3, %v2045_v19  ;;  %2197 = vmatpush.bf16.msrb.mxu2 %v2316_v14 }
 0x325   :  { %2198 = vmatpush.bf16.msrb.mxu2 %v2315_v53 }
 0x329   :  { %2199 = vmatpush.bf16.msrb.mxu2 %v2314_v55 }
 0x32d   :  { %2200 = vmatpush.bf16.msrb.mxu2 %v2313_v20 }
 0x367   :  { %v1788_v3 = vpop.f32.mrf.mxu1 }
 0x36f   :  { %v1790_v21 = vpop.f32.mrf.mxu1 }
 0x374   :  { %v1737_v44 = vpop.f32.mrf.mxu3 }
 0x378   :  { %v1888_v43 = vpop.f32.mrf.mxu1 }
 0x37c   :  { %v1739_v16 = vpop.f32.mrf.mxu3 }
 0x380   :  { %v1890_v52 = vpop.f32.mrf.mxu1 }
 0x384   :  { %v1838_v5 = vpop.f32.mrf.mxu3 }
 0x388   :  { %v2008_v10 = vpop.f32.mrf.mxu1 }
 0x389   :  { %v2336_v11 = vpack.i.bf16 %v2008_v10, %v1788_v3 }
 0x38b   :  { %2337 = vrot.lane.b32.xlu2 %v2336_v11, %s2428_s22 }
 0x38c   :  { %v1840_v60 = vpop.f32.mrf.mxu3 }
 0x390   :  { %v2010_v12 = vpop.f32.mrf.mxu1 }
 0x394   :  { %v1957_v6 = vpop.f32.mrf.mxu3 }
 0x398   :  { %v2108_v56 = vpop.f32.mrf.mxu1 }
 0x399   :  { %v2346_v13 = vpack.i.bf16 %v2108_v56, %v1888_v43 }
 0x39b   :  { %2347 = vrot.lane.b32.xlu1 %v2346_v13, %s2422_s16  ;;  %s2430_s16 = smov 128  }
 0x39c   :  { %v1959_v31 = vpop.f32.mrf.mxu3 }
 0x3a0   :  { %v2110_v59 = vpop.f32.mrf.mxu1 }
 0x3a4   :  { %v2058_v58 = vpop.f32.mrf.mxu3 }
 0x3a5   :  { %v2341_v45 = vpack.i.bf16 %v2058_v58, %v1838_v5 }
 0x3a7   :  { %2342 = vrot.lane.b32.xlu0 %v2341_v45, %s2419_s13  ;;  %s2219_s13 = sshll.u32 %s2429_s12, 4  ;;  %s2220_s13 = int_to_ptr.vmem [resolvable:$true] %s2219_s13 }
 0x3ac   :  { %v2060_v18 = vpop.f32.mrf.mxu3 }
 0x3e5   :  { %v2338_v39 = vpop.permute.xlu2 %2337 }
 0x3e6   :  { %v2340_v48 = vunpack.i.h.bf16 %v2338_v39  ;;  %v2339_v26 = vunpack.i.l.bf16 %v2338_v39 }
 0x3e8   :  { %v1904_v28 = vsel %vm1669_vm1, %v1737_v44, %v2339_v26  ;;  %v2124_v7 = vsel %vm1669_vm1, %v1957_v6, %v2340_v48 }
 0x40d   :  { %v2348_v9 = vpop.permute.xlu1 %2347 }
 0x40e   :  { %v2350_v2 = vunpack.i.h.bf16 %v2348_v9  ;;  %v2349_v37 = vunpack.i.l.bf16 %v2348_v9 }
 0x419   :  { %v2343_v46 = vpop.permute.xlu0 %2342 }
 0x41a   :  { %v2345_v8 = vunpack.i.h.bf16 %v2343_v46  ;;  %v2344_v54 = vunpack.i.l.bf16 %v2343_v46 }
 0x41c   :  { %v2125_v61 = vsel %vm1905_vm4, %v2124_v7, %v2345_v8  ;;  %v1906_v22 = vsel %vm1905_vm4, %v1904_v28, %v2344_v54 }
 0x41d   :  { %v2126_v33 = vsel %vm1907_vm5, %v2125_v61, %v2350_v2  ;;  %v1908_v32 = vsel %vm1907_vm5, %v1906_v22, %v2349_v37 }
 0x41e   :  { %v2127_v0 = vpack.c.bf16 %v2126_v33, %v1908_v32 }
 0x420   :  { %2201 = vmatmul.bf16.vlgmr.msrb.gmra.mxu2 %v2127_v0 }
 0x4a3   :  { %v2202_v25 = vpop.f32.mrf.mxu2 }
 0x4a4   :  { %v2203_v23 = vadd.f32 %v2354_v34, %v2202_v25 }
 0x4a6   :  { %v2207_v41 = vadd.f32 %v2203_v23, %v3816_v63 }
 0x4a8   :  { %v2209_v36 = vmax.f32 %v2207_v41, 0.0 }
 0x4aa   :  { %v2211_v62 = vadd.f32 %v2209_v36, %v82_v47 }
 0x4ab   :  { %v2204_v50 = vpop.f32.mrf.mxu2 }
 0x4ac   :  { %2213 = vst.msk [vmem:[#allocation2] sm:$0xff] %vm1669_vm1, %v2211_v62  ;;  %v2205_v15 = vadd.f32 %v2354_v34, %v2204_v50 }
 0x4ae   :  { %v2208_v40 = vadd.f32 %v2205_v15, %v3828_v17 }
 0x4b0   :  { %v2210_v49 = vmax.f32 %v2208_v40, 0.0 }
 0x4b2   :  { %v2212_v63 = vadd.f32 %v2210_v49, %v83_v27 }
 0x4b4   :  { %2214 = vst.msk [vmem:[#allocation2 + $0x8] sm:$0xff] %vm1669_vm1, %v2212_v63 }
 0x4b5   :  { %2227 = dma.vmem_to_hbm [thread:$0]  %s2220_s13, 256, %s2222_s6, [#allocation3], %s2430_s16, %s2430_s16, %s2431_s17  }
 0x4b6   :  { %2415 = dma.done.wait [#allocation3], 256  }
 0x4b7   :  { %2416 = vsyncadd [#allocation3], 4294967040 }
 0x4b8   :  { %2232 = vsyncpa [#allocation3], 1 }

</bundles_post_ra>
